<compile_context>
chip_gen: v7x
topology: tpu7x:2x2x1
jax: 0.10.0
libtpu: 0.0.40
codegen_flags: <defaults>
</compile_context>

<pallas_src>
import functools

import jax
import jax.numpy as jnp
from jax.experimental import pallas as pl
from jax.experimental.pallas import tpu as pltpu

INPUT_DIMS = 3
INTERNAL_DIMS = 128
OUTPUT_DIMS = 4
PADDED_OUT_ROWS = 8   # output rows padded 4 -> 8 (one f32 sublane tile); extra rows are 0
HIDDEN = 5            # 1 input layer + (HIDDEN-1) hidden layers + 1 output layer
MULTIRES = 2
EMBED_DIMS = INPUT_DIMS * (1 + 2 * MULTIRES)  # 15
N_SLABS = 1 + 2 * MULTIRES                     # [x, sin x, cos x, sin 2x, cos 2x]


# ---------------------------------------------------------------------------
# Kernel
# ---------------------------------------------------------------------------
def decoder_kernel(p_ref, w0_ref, wh_ref, w5_ref, o_ref):
    # p_ref : (3, TM)        f32   feature-major point tile
    # w0_ref: (5, 128, 3)    bf16  first-layer weight, one (out,in) slab per embed term
    # wh_ref: (4, 128, 128)  bf16  hidden-layer weights, (out, in)
    # w5_ref: (8, 128)       bf16  output weight, rows 4..7 are zero padding
    # o_ref : (8, TM)        f32   feature-major output tile (rows 4..7 are 0)
    x = p_ref[...]                      # (3, TM) f32

    # Embedding terms.  Only one sin/cos polynomial pair per element; the
    # second frequency band uses exact double-angle identities.
    s1 = jnp.sin(x)
    c1 = jnp.cos(x)
    s2 = 2.0 * s1 * c1                  # sin(2x)
    c2 = 1.0 - 2.0 * s1 * s1            # cos(2x)

    def fdot(w_bf16, a_f32):
        # (128, 3) @ (3, TM) -> (128, TM), bf16 operands, f32 accumulation.
        return jnp.dot(w_bf16, a_f32.astype(jnp.bfloat16),
                       preferred_element_type=jnp.float32)

    # First layer as split-and-sum of embed(p) @ W0 (no lane/sublane concat).
    h = fdot(w0_ref[0], x)
    h += fdot(w0_ref[1], s1)
    h += fdot(w0_ref[2], c1)
    h += fdot(w0_ref[3], s2)
    h += fdot(w0_ref[4], c2)
    h = jnp.maximum(h, 0.0)             # (128, TM)

    # Hidden layers: W^T @ h, bf16 operands, f32 accumulation.
    for i in range(HIDDEN - 1):
        h = jnp.maximum(
            jnp.dot(wh_ref[i], h.astype(jnp.bfloat16),
                    preferred_element_type=jnp.float32), 0.0)

    # Output layer -> tiny (8, TM) block; padded weight rows are zero.
    o_ref[...] = jnp.dot(w5_ref[...], h.astype(jnp.bfloat16),
                         preferred_element_type=jnp.float32)


# ---------------------------------------------------------------------------
# Wrapper
# ---------------------------------------------------------------------------
def _choose_tm(n):
    """Row-tile size: big tiles amortize per-step pipeline overhead, but keep
    the grid length >= 2 so both v7x TensorCores get work."""
    tm = 128
    while tm * 4 <= n and tm < 2048:
        tm *= 2
    return tm


def prepare_weights(weights):
    """One-time weight prep (hoisted out of the jitted forward).

    `weights` is a list of 6 (in, out) f32 matrices (x @ W orientation, i.e.
    torch_weight.T).  Returns the kernel operands in (out, in) orientation:
      w0_stack: (5, 128, 3) bf16   slabs for [x, sin x, cos x, sin 2x, cos 2x]
      wh_stack: (4, 128, 128) bf16
      w5_pad  : (8, 128) bf16      rows 4..7 zero
    """
    w0_t = weights[0].T.astype(jnp.bfloat16)                       # (128, 15)
    w0_stack = jnp.stack(
        [w0_t[:, 3 * e:3 * e + 3] for e in range(N_SLABS)], axis=0)  # (5,128,3)
    wh_stack = jnp.stack(
        [w.T.astype(jnp.bfloat16) for w in weights[1:-1]], axis=0)   # (4,128,128)
    w5_pad = jnp.zeros((PADDED_OUT_ROWS, INTERNAL_DIMS), jnp.bfloat16)
    w5_pad = w5_pad.at[:OUTPUT_DIMS, :].set(weights[-1].T.astype(jnp.bfloat16))
    return (jax.device_put(w0_stack), jax.device_put(wh_stack),
            jax.device_put(w5_pad))


@functools.partial(jax.jit, static_argnames=("tm",))
def _decoder_forward_impl(p, w0_stack, wh_stack, w5_pad, *, tm):
    n = p.shape[0]
    n_pad = ((n + tm - 1) // tm) * tm

    # Feature-major input: (3, n_pad).  Padded rows produce garbage (cos(0)=1
    # through a bias-free net) and are sliced off below.
    pt = p.T.astype(jnp.float32)
    if n_pad != n:
        pt = jnp.pad(pt, ((0, 0), (0, n_pad - n)))

    def resident(shape):
        # Grid-invariant weights: constant index_map keeps them in VMEM.
        nd = len(shape)
        return pl.BlockSpec(shape, lambda i, _nd=nd: (0,) * _nd)

    out_t = pl.pallas_call(
        decoder_kernel,
        out_shape=jax.ShapeDtypeStruct((PADDED_OUT_ROWS, n_pad), jnp.float32),
        grid_spec=pltpu.PrefetchScalarGridSpec(
            num_scalar_prefetch=0,
            grid=(n_pad // tm,),
            in_specs=[
                pl.BlockSpec((INPUT_DIMS, tm), lambda i: (0, i)),
                resident(w0_stack.shape),
                resident(wh_stack.shape),
                resident(w5_pad.shape),
            ],
            out_specs=pl.BlockSpec((PADDED_OUT_ROWS, tm), lambda i: (0, i)),
        ),
        compiler_params=pltpu.CompilerParams(
            dimension_semantics=("parallel",)),
    )(pt, w0_stack, wh_stack, w5_pad)

    # Tiny epilogue: (8, n_pad) -> (n, 4).
    return out_t[:OUTPUT_DIMS, :n].T


def decoder_forward(p, prepped_weights, *, tm=None):
    if tm is None:
        tm = _choose_tm(p.shape[0])
    return _decoder_forward_impl(p, *prepped_weights, tm=tm)


# ---------------------------------------------------------------------------
# Init + references
# ---------------------------------------------------------------------------
def init_weights(key):
    """Deterministic init mimicking torch.nn.Linear default
    (uniform +-1/sqrt(fan_in)), stored as (in, out) so x @ W == x @ W_torch.T."""
    dims = [(EMBED_DIMS, INTERNAL_DIMS)]
    dims += [(INTERNAL_DIMS, INTERNAL_DIMS)] * (HIDDEN - 1)
    dims += [(INTERNAL_DIMS, OUTPUT_DIMS)]
    keys = jax.random.split(key, len(dims))
    weights = []
    for k, (fan_in, fan_out) in zip(keys, dims):
        bound = 1.0 / (fan_in ** 0.5)
        weights.append(
            jax.random.uniform(k, (fan_in, fan_out), jnp.float32, -bound, bound))
    return weights


def _embed(x):
    """Positional embedding, matches Embedder with multires=2 / log_sampling."""
    parts = [x]
    for e in range(MULTIRES):
        freq = 2.0 ** e
        parts.append(jnp.sin(x * freq))
        parts.append(jnp.cos(x * freq))
    return jnp.concatenate(parts, axis=-1)


def decoder_reference_f32(p, weights):
    """Pure f32 reference (PyTorch-equivalent semantics)."""
    h = _embed(p)
    for w in weights[:-1]:
        h = jnp.maximum(h @ w, 0.0)
    return h @ weights[-1]


def decoder_reference_mixed(p, weights):
    """Pure-JAX reference following the kernel's dtype/math path
    (double-angle embedding, split-and-sum first layer, bf16 operands with
    f32 accumulation)."""
    x = p.astype(jnp.float32)
    s1, c1 = jnp.sin(x), jnp.cos(x)
    s2 = 2.0 * s1 * c1
    c2 = 1.0 - 2.0 * s1 * s1
    slabs = [x, s1, c1, s2, c2]
    w0 = weights[0].astype(jnp.bfloat16)                            # (15, 128)
    h = jnp.zeros((p.shape[0], INTERNAL_DIMS), jnp.float32)
    for e, slab in enumerate(slabs):
        h += jnp.dot(slab.astype(jnp.bfloat16), w0[3 * e:3 * e + 3, :],
                     preferred_element_type=jnp.float32)
    h = jnp.maximum(h, 0.0)
    for w in weights[1:-1]:
        h = jnp.maximum(
            jnp.dot(h.astype(jnp.bfloat16), w.astype(jnp.bfloat16),
                    preferred_element_type=jnp.float32), 0.0)
    return jnp.dot(h.astype(jnp.bfloat16), weights[-1].astype(jnp.bfloat16),
                   preferred_element_type=jnp.float32)


# ---------------------------------------------------------------------------
if __name__ == "__main__":
    key = jax.random.PRNGKey(0)
    kp, kw = jax.random.split(key)

    # pre_train_sphere samples (1024, 3) points; use the same shape here.
    N = 1024
    p = jax.random.uniform(kp, (N, INPUT_DIMS), jnp.float32) - 0.5
    weights = init_weights(kw)
    prepped = prepare_weights(weights)   # one-time prep, outside the jitted forward

    out = decoder_forward(p, prepped)    # tm=512 -> grid of 2 (both v7x cores busy)
    out = jax.block_until_ready(out)
    assert out.shape == (N, OUTPUT_DIMS)

    # Check against a pure-JAX reference with the same dtype/math path.
    ref_mixed = decoder_reference_mixed(p, weights)
    assert jnp.allclose(out, ref_mixed, atol=1e-2, rtol=1e-2), "mismatch vs mixed ref"

    # Loose check against the full-f32 (PyTorch-equivalent) reference.
    ref_f32 = decoder_reference_f32(p, weights)
    assert jnp.allclose(out, ref_f32, atol=5e-2, rtol=5e-2), "mismatch vs f32 ref"

    # Ragged-N check exercises the row-padding + slice-off path.
    N2 = 300
    p2 = jax.random.uniform(jax.random.PRNGKey(3), (N2, INPUT_DIMS), jnp.float32) - 0.5
    out2 = jax.block_until_ready(decoder_forward(p2, prepped))
    assert out2.shape == (N2, OUTPUT_DIMS)
    assert jnp.allclose(out2, decoder_reference_f32(p2, weights),
                        atol=5e-2, rtol=5e-2), "mismatch vs f32 ref (ragged N)"

    print("KERNEL_OK")
</pallas_src>

<mosaic_0001>
module attributes {stable_mosaic.version = 11 : i64} {
  func.func @decoder_kernel(%arg0: i32, %arg1: memref<3x512xf32, #tpu.memory_space<vmem>>, %arg2: memref<5x128x3xbf16, #tpu.memory_space<vmem>>, %arg3: memref<4x128x128xbf16, #tpu.memory_space<vmem>>, %arg4: memref<8x128xbf16, #tpu.memory_space<vmem>>, %arg5: memref<8x512xf32, #tpu.memory_space<vmem>>) attributes {dimension_semantics = [#tpu.dimension_semantics<parallel>], iteration_bounds = array<i64: 2>, scalar_prefetch = 0 : i64, scratch_operands = 0 : i64, tpu.core_type = #tpu.core_type<tc>, window_params = [{transform_indices = @transform_0, window_bounds = array<i64: 3, 512>}, {pipeline_mode = #tpu.pipeline_mode<synchronous>, transform_indices = @transform_1, window_bounds = array<i64: 5, 128, 3>}, {pipeline_mode = #tpu.pipeline_mode<synchronous>, transform_indices = @transform_2, window_bounds = array<i64: 4, 128, 128>}, {pipeline_mode = #tpu.pipeline_mode<synchronous>, transform_indices = @transform_3, window_bounds = array<i64: 8, 128>}, {transform_indices = @transform_4, window_bounds = array<i64: 8, 512>}]} {
    %c0 = arith.constant 0 : index
    %c0_0 = arith.constant 0 : index
    %0 = vector.load %arg1[%c0, %c0_0] : memref<3x512xf32, #tpu.memory_space<vmem>>, vector<3x512xf32>
    %1 = math.sin %0 : vector<3x512xf32>
    %2 = math.cos %0 : vector<3x512xf32>
    %cst = arith.constant 2.000000e+00 : f32
    %3 = vector.broadcast %cst : f32 to vector<3x512xf32>
    %4 = arith.mulf %3, %1 : vector<3x512xf32>
    %5 = arith.mulf %4, %2 : vector<3x512xf32>
    %cst_1 = arith.constant 2.000000e+00 : f32
    %6 = vector.broadcast %cst_1 : f32 to vector<3x512xf32>
    %7 = arith.mulf %6, %1 : vector<3x512xf32>
    %8 = arith.mulf %7, %1 : vector<3x512xf32>
    %cst_2 = arith.constant 1.000000e+00 : f32
    %9 = vector.broadcast %cst_2 : f32 to vector<3x512xf32>
    %10 = arith.subf %9, %8 : vector<3x512xf32>
    %c0_3 = arith.constant 0 : index
    %c0_4 = arith.constant 0 : index
    %c0_5 = arith.constant 0 : index
    %11 = vector.load %arg2[%c0_3, %c0_4, %c0_5] : memref<5x128x3xbf16, #tpu.memory_space<vmem>>, vector<1x128x3xbf16>
    %12 = vector.shape_cast %11 : vector<1x128x3xbf16> to vector<128x3xbf16>
    %13 = arith.truncf %0 : vector<3x512xf32> to vector<3x512xbf16>
    %cst_6 = arith.constant dense<0.000000e+00> : vector<128x512xf32>
    %14 = tpu.matmul %12, %13, %cst_6 {dimension_numbers = #tpu.dot_dimension_numbers<[1], [0], [0], [1], [0, 0, 1, 1], [], []>} : vector<128x3xbf16>, vector<3x512xbf16>, vector<128x512xf32> -> vector<128x512xf32>
    %c1 = arith.constant 1 : index
    %c0_7 = arith.constant 0 : index
    %c0_8 = arith.constant 0 : index
    %15 = vector.load %arg2[%c1, %c0_7, %c0_8] : memref<5x128x3xbf16, #tpu.memory_space<vmem>>, vector<1x128x3xbf16>
    %16 = vector.shape_cast %15 : vector<1x128x3xbf16> to vector<128x3xbf16>
    %17 = arith.truncf %1 : vector<3x512xf32> to vector<3x512xbf16>
    %cst_9 = arith.constant dense<0.000000e+00> : vector<128x512xf32>
    %18 = tpu.matmul %16, %17, %cst_9 {dimension_numbers = #tpu.dot_dimension_numbers<[1], [0], [0], [1], [0, 0, 1, 1], [], []>} : vector<128x3xbf16>, vector<3x512xbf16>, vector<128x512xf32> -> vector<128x512xf32>
    %19 = arith.addf %14, %18 : vector<128x512xf32>
    %c2 = arith.constant 2 : index
    %c0_10 = arith.constant 0 : index
    %c0_11 = arith.constant 0 : index
    %20 = vector.load %arg2[%c2, %c0_10, %c0_11] : memref<5x128x3xbf16, #tpu.memory_space<vmem>>, vector<1x128x3xbf16>
    %21 = vector.shape_cast %20 : vector<1x128x3xbf16> to vector<128x3xbf16>
    %22 = arith.truncf %2 : vector<3x512xf32> to vector<3x512xbf16>
    %cst_12 = arith.constant dense<0.000000e+00> : vector<128x512xf32>
    %23 = tpu.matmul %21, %22, %cst_12 {dimension_numbers = #tpu.dot_dimension_numbers<[1], [0], [0], [1], [0, 0, 1, 1], [], []>} : vector<128x3xbf16>, vector<3x512xbf16>, vector<128x512xf32> -> vector<128x512xf32>
    %24 = arith.addf %19, %23 : vector<128x512xf32>
    %c3 = arith.constant 3 : index
    %c0_13 = arith.constant 0 : index
    %c0_14 = arith.constant 0 : index
    %25 = vector.load %arg2[%c3, %c0_13, %c0_14] : memref<5x128x3xbf16, #tpu.memory_space<vmem>>, vector<1x128x3xbf16>
    %26 = vector.shape_cast %25 : vector<1x128x3xbf16> to vector<128x3xbf16>
    %27 = arith.truncf %5 : vector<3x512xf32> to vector<3x512xbf16>
    %cst_15 = arith.constant dense<0.000000e+00> : vector<128x512xf32>
    %28 = tpu.matmul %26, %27, %cst_15 {dimension_numbers = #tpu.dot_dimension_numbers<[1], [0], [0], [1], [0, 0, 1, 1], [], []>} : vector<128x3xbf16>, vector<3x512xbf16>, vector<128x512xf32> -> vector<128x512xf32>
    %29 = arith.addf %24, %28 : vector<128x512xf32>
    %c4 = arith.constant 4 : index
    %c0_16 = arith.constant 0 : index
    %c0_17 = arith.constant 0 : index
    %30 = vector.load %arg2[%c4, %c0_16, %c0_17] : memref<5x128x3xbf16, #tpu.memory_space<vmem>>, vector<1x128x3xbf16>
    %31 = vector.shape_cast %30 : vector<1x128x3xbf16> to vector<128x3xbf16>
    %32 = arith.truncf %10 : vector<3x512xf32> to vector<3x512xbf16>
    %cst_18 = arith.constant dense<0.000000e+00> : vector<128x512xf32>
    %33 = tpu.matmul %31, %32, %cst_18 {dimension_numbers = #tpu.dot_dimension_numbers<[1], [0], [0], [1], [0, 0, 1, 1], [], []>} : vector<128x3xbf16>, vector<3x512xbf16>, vector<128x512xf32> -> vector<128x512xf32>
    %34 = arith.addf %29, %33 : vector<128x512xf32>
    %cst_19 = arith.constant 0.000000e+00 : f32
    %35 = vector.broadcast %cst_19 : f32 to vector<128x512xf32>
    %36 = arith.maximumf %34, %35 : vector<128x512xf32>
    %c0_20 = arith.constant 0 : index
    %c0_21 = arith.constant 0 : index
    %c0_22 = arith.constant 0 : index
    %37 = vector.load %arg3[%c0_20, %c0_21, %c0_22] : memref<4x128x128xbf16, #tpu.memory_space<vmem>>, vector<1x128x128xbf16>
    %38 = vector.shape_cast %37 : vector<1x128x128xbf16> to vector<128x128xbf16>
    %39 = arith.truncf %36 : vector<128x512xf32> to vector<128x512xbf16>
    %cst_23 = arith.constant dense<0.000000e+00> : vector<128x512xf32>
    %40 = tpu.matmul %38, %39, %cst_23 {dimension_numbers = #tpu.dot_dimension_numbers<[1], [0], [0], [1], [0, 0, 1, 1], [], []>} : vector<128x128xbf16>, vector<128x512xbf16>, vector<128x512xf32> -> vector<128x512xf32>
    %cst_24 = arith.constant 0.000000e+00 : f32
    %41 = vector.broadcast %cst_24 : f32 to vector<128x512xf32>
    %42 = arith.maximumf %40, %41 : vector<128x512xf32>
    %c1_25 = arith.constant 1 : index
    %c0_26 = arith.constant 0 : index
    %c0_27 = arith.constant 0 : index
    %43 = vector.load %arg3[%c1_25, %c0_26, %c0_27] : memref<4x128x128xbf16, #tpu.memory_space<vmem>>, vector<1x128x128xbf16>
    %44 = vector.shape_cast %43 : vector<1x128x128xbf16> to vector<128x128xbf16>
    %45 = arith.truncf %42 : vector<128x512xf32> to vector<128x512xbf16>
    %cst_28 = arith.constant dense<0.000000e+00> : vector<128x512xf32>
    %46 = tpu.matmul %44, %45, %cst_28 {dimension_numbers = #tpu.dot_dimension_numbers<[1], [0], [0], [1], [0, 0, 1, 1], [], []>} : vector<128x128xbf16>, vector<128x512xbf16>, vector<128x512xf32> -> vector<128x512xf32>
    %cst_29 = arith.constant 0.000000e+00 : f32
    %47 = vector.broadcast %cst_29 : f32 to vector<128x512xf32>
    %48 = arith.maximumf %46, %47 : vector<128x512xf32>
    %c2_30 = arith.constant 2 : index
    %c0_31 = arith.constant 0 : index
    %c0_32 = arith.constant 0 : index
    %49 = vector.load %arg3[%c2_30, %c0_31, %c0_32] : memref<4x128x128xbf16, #tpu.memory_space<vmem>>, vector<1x128x128xbf16>
    %50 = vector.shape_cast %49 : vector<1x128x128xbf16> to vector<128x128xbf16>
    %51 = arith.truncf %48 : vector<128x512xf32> to vector<128x512xbf16>
    %cst_33 = arith.constant dense<0.000000e+00> : vector<128x512xf32>
    %52 = tpu.matmul %50, %51, %cst_33 {dimension_numbers = #tpu.dot_dimension_numbers<[1], [0], [0], [1], [0, 0, 1, 1], [], []>} : vector<128x128xbf16>, vector<128x512xbf16>, vector<128x512xf32> -> vector<128x512xf32>
    %cst_34 = arith.constant 0.000000e+00 : f32
    %53 = vector.broadcast %cst_34 : f32 to vector<128x512xf32>
    %54 = arith.maximumf %52, %53 : vector<128x512xf32>
    %c3_35 = arith.constant 3 : index
    %c0_36 = arith.constant 0 : index
    %c0_37 = arith.constant 0 : index
    %55 = vector.load %arg3[%c3_35, %c0_36, %c0_37] : memref<4x128x128xbf16, #tpu.memory_space<vmem>>, vector<1x128x128xbf16>
    %56 = vector.shape_cast %55 : vector<1x128x128xbf16> to vector<128x128xbf16>
    %57 = arith.truncf %54 : vector<128x512xf32> to vector<128x512xbf16>
    %cst_38 = arith.constant dense<0.000000e+00> : vector<128x512xf32>
    %58 = tpu.matmul %56, %57, %cst_38 {dimension_numbers = #tpu.dot_dimension_numbers<[1], [0], [0], [1], [0, 0, 1, 1], [], []>} : vector<128x128xbf16>, vector<128x512xbf16>, vector<128x512xf32> -> vector<128x512xf32>
    %cst_39 = arith.constant 0.000000e+00 : f32
    %59 = vector.broadcast %cst_39 : f32 to vector<128x512xf32>
    %60 = arith.maximumf %58, %59 : vector<128x512xf32>
    %c0_40 = arith.constant 0 : index
    %c0_41 = arith.constant 0 : index
    %61 = vector.load %arg4[%c0_40, %c0_41] : memref<8x128xbf16, #tpu.memory_space<vmem>>, vector<8x128xbf16>
    %62 = arith.truncf %60 : vector<128x512xf32> to vector<128x512xbf16>
    %cst_42 = arith.constant dense<0.000000e+00> : vector<8x512xf32>
    %63 = tpu.matmul %61, %62, %cst_42 {dimension_numbers = #tpu.dot_dimension_numbers<[1], [0], [0], [1], [0, 0, 1, 1], [], []>} : vector<8x128xbf16>, vector<128x512xbf16>, vector<8x512xf32> -> vector<8x512xf32>
    %c0_43 = arith.constant 0 : index
    %c0_44 = arith.constant 0 : index
    %64 = vector.load %arg5[%c0_43, %c0_44] : memref<8x512xf32, #tpu.memory_space<vmem>>, vector<8x512xf32>
    tpu.vector_store %arg5[%c0_43, %c0_44], %63 {strides = array<i32>} : memref<8x512xf32, #tpu.memory_space<vmem>>, vector<8x512xf32>,
    return
  }
  func.func @transform_0(%arg0: i32) -> (i32, i32) {
    %c0_i32 = arith.constant 0 : i32
    %c0_i32_0 = arith.constant 0 : i32
    return %c0_i32, %arg0 : i32, i32
  }
  func.func @transform_1(%arg0: i32) -> (i32, i32, i32) {
    %c0_i32 = arith.constant 0 : i32
    %c0_i32_0 = arith.constant 0 : i32
    %c0_i32_1 = arith.constant 0 : i32
    %c0_i32_2 = arith.constant 0 : i32
    return %c0_i32, %c0_i32_0, %c0_i32_1 : i32, i32, i32
  }
  func.func @transform_2(%arg0: i32) -> (i32, i32, i32) {
    %c0_i32 = arith.constant 0 : i32
    %c0_i32_0 = arith.constant 0 : i32
    %c0_i32_1 = arith.constant 0 : i32
    %c0_i32_2 = arith.constant 0 : i32
    return %c0_i32, %c0_i32_0, %c0_i32_1 : i32, i32, i32
  }
  func.func @transform_3(%arg0: i32) -> (i32, i32) {
    %c0_i32 = arith.constant 0 : i32
    %c0_i32_0 = arith.constant 0 : i32
    %c0_i32_1 = arith.constant 0 : i32
    return %c0_i32, %c0_i32_0 : i32, i32
  }
  func.func @transform_4(%arg0: i32) -> (i32, i32) {
    %c0_i32 = arith.constant 0 : i32
    %c0_i32_0 = arith.constant 0 : i32
    return %c0_i32, %arg0 : i32, i32
  }
}

</mosaic_0001>

<bundles_post_ra>
// kernel: _decoder_forward_impl.1
= control target key start
LH: loop header
LB: loop body
LE: loop exit
PB: predicated region body
PF: predicated region fallthrough
CT: control target
= control target key end

     0   :  { %s4947_s15 = smov 0   ;;  %s5588_s0 = inlined_call_operand.vmem [shape: f32[3,1024], index: 0, kind: input, shape index: {}]   ;;  %s5589_s1 = inlined_call_operand.vmem [shape: bf16[5,128,3], index: 1, kind: input, shape index: {}]   ;;  %s5590_s2 = inlined_call_operand.vmem [shape: bf16[4,128,128], index: 2, kind: input, shape index: {}]   ;;  %s5591_s3 = inlined_call_operand.vmem [shape: bf16[8,128], index: 3, kind: input, shape index: {}]   ;;  %s5592_s4 = inlined_call_operand.vmem [shape: f32[8,1024], index: 4, kind: output, shape index: {}]  }
   0x1 LB: > { %s4253_s16 = sadd.s32 4294967295, %s4912_s15   ;;  %p4257_p0 = scmp.ge.s32.totalorder %s4912_s15, 1  ;;  %s4912_s15 = sphi %s4947_s15, %s14_s15  }
   0x2   : > { %p163_p1 = scmp.lt.s32.totalorder %s4912_s15, 3 }
   0x4   : > { %p164_p2 = pnand %p4257_p0, %p163_p1 }
   0x5   : > { %s4258_s17 = sshll.u32 (!%p164_p2), %s4253_s16, 2  ;;  %v4914_v0 = vmov (!%p164_p2), 0   ;;  %v4915_v26 = vmov (!%p164_p2), 683565275   ;;  %v4916_v28 = vmov (!%p164_p2), 2475754826  }
   0x6   : > { %167 = sbr.rel (%p164_p2) target bundleno = 1982 (0x7be), region = 36  ;;  %p190_p3 = scmp.lt.s32.totalorder (!%p164_p2), %s4258_s17, 7  ;;  %792 = vmatprep.mubr.bf16.mxu0 (!%p164_p2), %v4914_v0  ;;  %905 = vmatprep.mubr.bf16.mxu1 (!%p164_p2), %v4914_v0  ;;  %v4917_v30 = vmov (!%p164_p2), 2131351028   ;;  %v4918_v32 = vmov (!%p164_p2), 2102212464  }
   0x7   : > { %v4919_v34 = vmov (!%p164_p2), 920167782   ;;  %v4920_v41 = vmov (!%p164_p2), 1326507024  }
   0xd   : > { %s5596_s17 = smov (!%p190_p3, %s4258_s17), 7 }
   0xe   : > { %s4259_s18 = sshll.u32 %s5596_s17, 2  ;;  %s4261_s24 = sshll.u32 %s5596_s17, 3 }
   0xf   : > { %s193_s21 = scalar_lea.vmem %s5588_s0, %s4259_s18  ;;  %s199_s27 = scalar_lea.vmem %s5592_s4, %s4261_s24 }
  0x10   : > { %v4963_v1 = vld [vmem:[%s193_s21] sm:$0x77]  ;;  %v4965_v2 = vld [vmem:[%s193_s21 + $0x8] sm:$0x77] }
  0x11   : > { %v204_v3 = vand.u32 2147483647, %v4963_v1  ;;  %v207_v4 = vand.u32 2139095040, %v4963_v1  ;;  %v308_v5 = vand.u32 2147483647, %v4965_v2  ;;  %v311_v6 = vand.u32 2139095040, %v4965_v2 }
  0x12   : > { %vm206_vm14 = vcmp.lt.s32.totalorder %v4963_v1, 0 }
  0x13   : > { %v208_v7 = vshrl.u32 %v207_v4, 23  ;;  %v211_v8 = vand.u32 8388607, %v204_v3  ;;  %v312_v9 = vshrl.u32 %v311_v6, 23  ;;  %v315_v10 = vand.u32 8388607, %v308_v5 }
  0x14   : > { %vm5027_vm13 = vcmp.le.f32.partialorder %v204_v3, 0.7853982 }
  0x15   : > { %v4262_v11 = vadd.s32 4294967169, %v208_v7  ;;  %v212_v12 = vor.u32 8388608, %v211_v8  ;;  %v4266_v13 = vadd.s32 4294967169, %v312_v9  ;;  %v316_v15 = vor.u32 8388608, %v315_v10 }
  0x17   : > { %v214_v14 = vadd.s32 1, %v4262_v11  ;;  %v318_v16 = vadd.s32 1, %v4266_v13  ;;  %v4975_v17 = vshll.u32 %v212_v12, 8  ;;  %v4977_v22 = vshll.u32 %v316_v15, 8 }
  0x19   : > { %vm215_vm0 = vcmp.gt.s32.totalorder %v214_v14, 0  ;;  %vm319_vm1 = vcmp.gt.s32.totalorder %v318_v16, 0 }
  0x1a   : > { %v216_v18 = vsel %vm215_vm0, %v214_v14, 0  ;;  %v320_v21 = vsel %vm319_vm1, %v318_v16, 0  ;;  %vm310_vm0 = vcmp.lt.s32.totalorder %v4965_v2, 0  ;;  %vm309_vm1 = vcmp.le.f32.partialorder %v308_v5, 0.7853982 }
  0x1b   : > { %v217_v19 = vshrl.u32 %v216_v18, 5  ;;  %v218_v20 = vand.u32 31, %v216_v18  ;;  %v4979_v23 = vshrl.u32 %v320_v21, 5  ;;  %v322_v24 = vand.u32 31, %v320_v21 }
  0x1c   : > { %v644_v5 = vcombine.high %v4963_v1, %v4963_v1 }
  0x1d   : > { %v219_v25 = vsub.s32 32, %v218_v20  ;;  %v221_v27 = vshll.u32 %v4915_v26, %v218_v20  ;;  %v224_v29 = vshll.u32 %v4916_v28, %v218_v20  ;;  %v227_v31 = vshll.u32 %v4917_v30, %v218_v20 }
  0x1e   : > { %v230_v33 = vshll.u32 %v4918_v32, %v218_v20  ;;  %v233_v35 = vshll.u32 %v4919_v34, %v218_v20  ;;  %vm236_vm2 = vcmp.lt.s32.totalorder %v217_v19, 1  ;;  %vm237_vm3 = vcmp.lt.s32.totalorder %v217_v19, 2 }
  0x1f   : > { %v220_v36 = vshrl.u32 %v4915_v26, %v219_v25  ;;  %v222_v37 = vshrl.u32 %v4916_v28, %v219_v25  ;;  %v225_v38 = vshrl.u32 %v4917_v30, %v219_v25  ;;  %v228_v39 = vshrl.u32 %v4918_v32, %v219_v25 }
  0x20   : > { %v231_v40 = vshrl.u32 %v4919_v34, %v219_v25  ;;  %v234_v42 = vshrl.u32 %v4920_v41, %v219_v25  ;;  %vm238_vm4 = vcmp.lt.s32.totalorder %v217_v19, 3  ;;  %vm239_vm5 = vcmp.lt.s32.totalorder %v217_v19, 4 }
  0x21   : > { %v223_v43 = vor.u32 %v222_v37, %v221_v27  ;;  %v226_v44 = vor.u32 %v225_v38, %v224_v29  ;;  %v229_v45 = vor.u32 %v228_v39, %v227_v31  ;;  %v323_v46 = vsub.s32 32, %v322_v24 }
  0x22   : > { %v232_v47 = vor.u32 %v231_v40, %v230_v33  ;;  %v235_v48 = vor.u32 %v234_v42, %v233_v35  ;;  %v325_v49 = vshll.u32 %v4915_v26, %v322_v24  ;;  %v328_v57 = vshll.u32 %v4916_v28, %v322_v24 }
  0x23   : > { %v240_v50 = vsel %vm236_vm2, %v220_v36, %v223_v43  ;;  %v241_v51 = vsel %vm239_vm5, %v229_v45, 2102212464  ;;  %v244_v52 = vsel %vm236_vm2, %v223_v43, %v226_v44  ;;  %v248_v53 = vsel %vm236_vm2, %v226_v44, %v229_v45 }
  0x24   : > { %v242_v54 = vsel %vm238_vm4, %v226_v44, %v241_v51  ;;  %v245_v55 = vsel %vm239_vm5, %v232_v47, 920167782  ;;  %v249_v56 = vsel %vm239_vm5, %v235_v48, 1326507024  ;;  %v324_v60 = vshrl.u32 %v4915_v26, %v323_v46 }
  0x25   : > { %v246_v58 = vsel %vm238_vm4, %v229_v45, %v245_v55  ;;  %v250_v59 = vsel %vm238_vm4, %v232_v47, %v249_v56  ;;  %v326_v61 = vshrl.u32 %v4916_v28, %v323_v46  ;;  %v243_v62 = vsel %vm237_vm3, %v240_v50, %v242_v54 }
  0x26   : > { %v247_v63 = vsel %vm237_vm3, %v244_v52, %v246_v58  ;;  %v251_v4 = vsel %vm237_vm3, %v248_v53, %v250_v59  ;;  %v329_v6 = vshrl.u32 %v4917_v30, %v323_v46  ;;  %v331_v13 = vshll.u32 %v4917_v30, %v322_v24 }
  0x27   : > { %v4991_v7 = vmul.u32.u64.low %v4975_v17, %v251_v4  ;;  %v4992_v8 = vmul.u32.u64.high %v4975_v17, %v251_v4, %v4991_v7  ;;  %v4995_v9 = vmul.u32.u64.low %v4975_v17, %v247_v63  ;;  %v4996_v10 = vmul.u32.u64.high %v4975_v17, %v247_v63, %v4995_v9 }
  0x28   : > { %v327_v11 = vor.u32 %v326_v61, %v325_v49  ;;  %v330_v12 = vor.u32 %v329_v6, %v328_v57  ;;  %v332_v14 = vshrl.u32 %v4918_v32, %v323_v46  ;;  %v334_v15 = vshll.u32 %v4918_v32, %v322_v24 }
  0x29   : > { %v335_v16 = vshrl.u32 %v4919_v34, %v323_v46  ;;  %v337_v18 = vshll.u32 %v4919_v34, %v322_v24  ;;  %v338_v20 = vshrl.u32 %v4920_v41, %v323_v46  ;;  %v259_v19 = vmul.u32 %v4975_v17, %v243_v62 }
  0x2a   : > { %v333_v21 = vor.u32 %v332_v14, %v331_v13  ;;  %vm340_vm6 = vcmp.lt.s32.totalorder %v4979_v23, 1  ;;  %vm341_vm7 = vcmp.lt.s32.totalorder %v4979_v23, 2  ;;  %vm261_vm8 = vc.u32 %v4992_v8, %v4995_v9 }
  0x2b   : > { %v262_v25 = vadd.s32 1, %v4996_v10  ;;  %v336_v26 = vor.u32 %v335_v16, %v334_v15  ;;  %vm342_vm9 = vcmp.lt.s32.totalorder %v4979_v23, 3  ;;  %v339_v27 = vor.u32 %v338_v20, %v337_v18 }
  0x2c   : > { %vm343_vm10 = vcmp.lt.s32.totalorder %v4979_v23, 4  ;;  %v344_v28 = vsel %vm340_vm6, %v324_v60, %v327_v11  ;;  %v348_v24 = vsel %vm340_vm6, %v327_v11, %v330_v12  ;;  %v352_v31 = vsel %vm340_vm6, %v330_v12, %v333_v21 }
  0x2d   : > { %v263_v29 = vsel %vm261_vm8, %v262_v25, %v4996_v10  ;;  %v345_v17 = vsel %vm343_vm10, %v333_v21, 2102212464  ;;  %v349_v30 = vsel %vm343_vm10, %v336_v26, 920167782  ;;  %v353_v35 = vsel %vm343_vm10, %v339_v27, 1326507024 }
  0x2e   : > { %v264_v32 = vadd.s32 %v263_v29, %v259_v19  ;;  %v346_v33 = vsel %vm342_vm9, %v330_v12, %v345_v17  ;;  %v350_v34 = vsel %vm342_vm9, %v333_v21, %v349_v30  ;;  %v354_v38 = vsel %vm342_vm9, %v336_v26, %v353_v35 }
  0x2f   : > { %v347_v36 = vsel %vm341_vm7, %v344_v28, %v346_v33  ;;  %v351_v37 = vsel %vm341_vm7, %v348_v24, %v350_v34  ;;  %v355_v40 = vsel %vm341_vm7, %v352_v31, %v354_v38  ;;  %v260_v59 = vadd.s32 %v4995_v9, %v4992_v8 }
  0x30   : > { %v265_v39 = vadd.s32 536870912, %v264_v32  ;;  %v5013_v41 = vmul.u32.u64.low %v4977_v22, %v351_v37  ;;  %v5014_v42 = vmul.u32.u64.high %v4977_v22, %v351_v37, %v5013_v41  ;;  %v363_v46 = vmul.u32 %v4977_v22, %v347_v36 }
  0x31   : > { %v5017_v43 = vmul.u32.u64.low %v4977_v22, %v355_v40  ;;  %v5018_v44 = vmul.u32.u64.high %v4977_v22, %v355_v40, %v5017_v43  ;;  %vm744_vm2 = vcmask 1040384   ;;  %vm296_vm9 = vweird.f32 %v4963_v1 }
  0x32   : > { %v266_v45 = vshrl.u32 %v265_v39, 30  ;;  %v366_v48 = vadd.s32 1, %v5014_v42  ;;  %vm745_vm10 = vcmask 1041408  }
  0x33   : > { %vm365_vm11 = vc.u32 %v5018_v44, %v5013_v41  ;;  %v364_v18 = vadd.s32 %v5013_v41, %v5018_v44 }
  0x34   : > { %v267_v47 = vshll.u32 %v266_v45, 30  ;;  %v367_v23 = vsel %vm365_vm11, %v366_v48, %v5014_v42  ;;  %v290_v4 = vsub.s32 4, %v266_v45 }
  0x35   : > { %v368_v50 = vadd.s32 %v367_v23, %v363_v46 }
  0x36   : > { %v268_v49 = vsub.s32 %v264_v32, %v267_v47  ;;  %v291_v13 = vsel %vm206_vm14, %v290_v4, %v266_v45 }
  0x37   : > { %v369_v52 = vadd.s32 536870912, %v368_v50  ;;  %v293_v3 = vsel %vm5027_vm13, 0, %v291_v13 }
  0x38   : > { %v270_v51 = vsub.s32 0, %v268_v49  ;;  %v297_v17 = vadd.s32 3, %v293_v3  ;;  %v505_v42 = vand.u32 3, %v293_v3 }
  0x39   : > { %v370_v54 = vshrl.u32 %v369_v52, 30 }
  0x3a   : > { %v4263_v53 = vmin.u32 %v270_v51, %v268_v49  ;;  %v298_v41 = vand.u32 3, %v297_v17  ;;  %vm510_vm4 = vcmp.eq.s32.totalorder %v505_v42, 2  ;;  %vm507_vm6 = vcmp.eq.s32.totalorder %v505_v42, 0 }
  0x3b   : > { %v371_v56 = vshll.u32 %v370_v54, 30  ;;  %v394_v32 = vsub.s32 4, %v370_v54  ;;  %vm506_vm8 = vcmp.lt.s32.totalorder %v505_v42, 2  ;;  %v4829_v42 = vld [vmem:[%s5589_s1 + $0x58] sm:$0xff]  }
  0x3c   : > { %v272_v55 = vclz %v4263_v53  ;;  %vm303_vm3 = vcmp.eq.s32.totalorder %v298_v41, 2  ;;  %vm300_vm5 = vcmp.eq.s32.totalorder %v298_v41, 0  ;;  %vm299_vm7 = vcmp.lt.s32.totalorder %v298_v41, 2 }
  0x3d   : > { %v372_v58 = vsub.s32 %v368_v50, %v371_v56  ;;  %v395_v40 = vsel %vm310_vm0, %v394_v32, %v370_v54  ;;  %v4921_v54 = vmov 65535   ;;  %v649_v56 = vpack.c.bf16 %v644_v5, %v644_v5 }
  0x3e   : > { %v4264_v57 = vadd.s32 4294967294, %v272_v55  ;;  %v397_v45 = vsel %vm309_vm1, 0, %v395_v40  ;;  %v746_v55 = vsel %vm744_vm2, 4294967295, %v4921_v54  ;;  %vm719_vm2 = vcmask 23552  }
  0x3f   : > { %v374_v60 = vsub.s32 0, %v372_v58 }
  0x40   : > { %vm4265_vm12 = vcmp.lt.s32.totalorder %v4264_v57, 0 }
  0x41   : > { %v275_v22 = vsel %vm4265_vm12, 0, %v4264_v57  ;;  %v4267_v6 = vmin.u32 %v374_v60, %v372_v58 }
  0x42   : > { %v276_v61 = vsub.s32 32, %v275_v22  ;;  %v277_v62 = vshll.u32 %v268_v49, %v275_v22  ;;  %v280_v63 = vsub.s32 4294967266, %v275_v22  ;;  %v401_v49 = vadd.s32 3, %v397_v45 }
  0x43   : > { %v376_v12 = vclz %v4267_v6  ;;  %v608_v22 = vand.u32 3, %v397_v45  ;;  %v4832_v45 = vld [vmem:[%s5589_s1 + $0x70] sm:$0xff]  }
  0x44   : > { %v278_v7 = vshrl.u32 %v260_v59, %v276_v61  ;;  %v281_v10 = vadd.s32 127, %v280_v63  ;;  %v402_v59 = vand.u32 3, %v401_v49  ;;  %v5060_v63 = vsel %vm745_vm10, %v746_v55, 0 }
  0x45   : > { %v4268_v14 = vadd.s32 4294967294, %v376_v12  ;;  %vm609_vm12 = vcmp.lt.s32.totalorder %v608_v22, 2 }
  0x46   : > { %v279_v8 = vor.u32 %v278_v7, %v277_v62  ;;  %v282_v9 = vshll.u32 %v281_v10, 23  ;;  %v1054_v7 = vand.u32 %v5060_v63, %v649_v56  ;;  %v648_v10 = vpack.c.bf16 %v4963_v1, %v4963_v1 }
  0x47   : > { %vm4269_vm15 = vcmp.lt.s32.totalorder %v4268_v14, 0  ;;  %vm407_vm11 = vcmp.eq.s32.totalorder %v402_v59, 2 }
  0x48   : > { %v283_v15 = vor.u32 4788187, %v282_v9  ;;  %v286_v16 = vcvt.s32.f32 %v279_v8  ;;  %v379_v19 = vsel %vm4269_vm15, 0, %v4268_v14  ;;  %vm610_vm15 = vcmp.eq.s32.totalorder %v608_v22, 0 }
  0x49   : > { %v380_v21 = vsub.s32 32, %v379_v19  ;;  %v381_v25 = vshll.u32 %v372_v58, %v379_v19  ;;  %v384_v26 = vsub.s32 4294967266, %v379_v19 }
  0x4a   : > { %v284_v20 = vand.u32 2147483647, %v283_v15 }
  0x4b   : > { %v382_v28 = vshrl.u32 %v364_v18, %v380_v21  ;;  %v385_v24 = vadd.s32 127, %v384_v26  ;;  %v4824_v21 = vld [vmem:[%s5589_s1 + $0x40] sm:$0xff]  }
  0x4c   : > { %v287_v27 = vmul.f32 %v286_v16, %v284_v20  ;;  %v645_v20 = vcombine.high %v4965_v2, %v4965_v2 }
  0x4d   : > { %v383_v30 = vor.u32 %v382_v28, %v381_v25  ;;  %v386_v31 = vshll.u32 %v385_v24, 23 }
  0x4e   : > { %v288_v29 = vxor.u32 2147483648, %v287_v27 }
  0x4f   : > { %v387_v35 = vor.u32 4788187, %v386_v31  ;;  %v390_v36 = vcvt.s32.f32 %v383_v30  ;;  %v651_v31 = vpack.c.bf16 %v645_v20, %v645_v20 }
  0x50   : > { %v289_v33 = vsel %vm206_vm14, %v288_v29, %v287_v27  ;;  %vm404_vm14 = vcmp.eq.s32.totalorder %v402_v59, 0  ;;  %v1051_v27 = vand.u32 %v5060_v63, %v648_v10 }
  0x51   : > { %v292_v34 = vsel %vm5027_vm13, %v4963_v1, %v289_v33  ;;  %v388_v37 = vand.u32 2147483647, %v387_v35  ;;  %vm613_vm13 = vcmp.eq.s32.totalorder %v608_v22, 2  ;;  %v650_v35 = vpack.c.bf16 %v4965_v2, %v4965_v2 }
  0x52   : > { %4898 = vcosq.f32 %v292_v34 }
  0x53   : > { %4900 = vsinq.f32 %v292_v34  ;;  %v391_v38 = vmul.f32 %v390_v36, %v388_v37  ;;  %v1060_v37 = vand.u32 %v5060_v63, %v651_v31  ;;  %v1057_v40 = vand.u32 %v5060_v63, %v650_v35  ;;  %v4850_v31 = vld [vmem:[%s5589_s1 + $0xc0] sm:$0xff]  }
  0x55   : > { %v392_v39 = vxor.u32 2147483648, %v391_v38 }
  0x57   : > { %v393_v43 = vsel %vm310_vm0, %v392_v39, %v391_v38  ;;  %vm403_vm0 = vcmp.lt.s32.totalorder %v402_v59, 2  ;;  %v4827_v39 = vld [vmem:[%s5589_s1 + $0x48] sm:$0xff]  }
  0x58   : > { %v396_v44 = vsel %vm309_vm1, %v4965_v2, %v393_v43  ;;  %vm400_vm1 = vweird.f32 %v4965_v2  ;;  %v4828_v2 = vld [vmem:[%s5589_s1 + $0x50] sm:$0xff]   ;;  %v4830_v43 = vld [vmem:[%s5589_s1 + $0x60] sm:$0xff]  }
  0x59   : > { %4902 = vcosq.f32 %v396_v44 }
  0x5a   : > { %4904 = vsinq.f32 %v396_v44  ;;  %v4831_v44 = vld [vmem:[%s5589_s1 + $0x68] sm:$0xff]  }
  0x5c   : > { %v4899_v46 = vpop.eup %4898 }
  0x5d   : > { %v4901_v47 = vpop.eup %4900  ;;  %v304_v48 = vxor.u32 2147483648, %v4899_v46 }
  0x5e   : > { %v301_v23 = vxor.u32 2147483648, %v4901_v47 }
  0x5f   : > { %v305_v50 = vsel %vm303_vm3, %v304_v48, %v4901_v47  ;;  %v512_v51 = vsel %vm510_vm4, %v304_v48, %v4901_v47  ;;  %v4833_v47 = vld [vmem:[%s5589_s1 + $0x78] sm:$0xff]  }
  0x60   : > { %v302_v52 = vsel %vm300_vm5, %v4899_v46, %v301_v23  ;;  %v509_v53 = vsel %vm507_vm6, %v4899_v46, %v301_v23 }
  0x61   : > { %v306_v57 = vsel %vm299_vm7, %v302_v52, %v305_v50  ;;  %v513_v58 = vsel %vm506_vm8, %v509_v53, %v512_v51  ;;  %v4834_v52 = vld [vmem:[%s5589_s1] sm:$0xff]  }
  0x62   : > { %v5054_v60 = vsel %vm296_vm9, nan, %v306_v57  ;;  %v5056_v61 = vsel %vm296_vm9, nan, %v513_v58  ;;  %v4835_v58 = vld [vmem:[%s5589_s1 + $0x8] sm:$0xff]  }
  0x63   : > { %v671_v62 = vcombine.high %v5054_v60, %v5054_v60  ;;  %v675_v4 = vpack.c.bf16 %v5054_v60, %v5054_v60  ;;  %v1307_v6 = vcombine.high %v5056_v61, %v5056_v61  ;;  %v4903_v11 = vpop.eup %4902  ;;  %v618_v46 = vmul.f32 2.0, %v5054_v60 }
  0x64   : > { %v4905_v8 = vpop.eup %4904  ;;  %v408_v9 = vxor.u32 2147483648, %v4903_v11  ;;  %v1311_v23 = vpack.c.bf16 %v5056_v61, %v5056_v61 }
  0x65   : > { %v676_v12 = vpack.c.bf16 %v671_v62, %v671_v62  ;;  %v749_v13 = vand.u32 %v5060_v63, %v675_v4  ;;  %v405_v15 = vxor.u32 2147483648, %v4905_v8  ;;  %v1312_v16 = vpack.c.bf16 %v1307_v6, %v1307_v6  ;;  %v4837_v62 = vld [vmem:[%s5589_s1 + $0x18] sm:$0xff]   ;;  %v4838_v4 = vld [vmem:[%s5589_s1 + $0x20] sm:$0xff]   ;;  %v4839_v6 = vld [vmem:[%s5589_s1 + $0x28] sm:$0xff]  }
  0x66   : > { %v409_v18 = vsel %vm407_vm11, %v408_v9, %v4905_v8  ;;  %v615_v1 = vsel %vm613_vm13, %v408_v9, %v4905_v8  ;;  %v5143_v5 = vmul.f32 %v618_v46, %v5056_v61  ;;  %v1380_v53 = vand.u32 %v1311_v23, %v5060_v63  ;;  %v4836_v61 = vld [vmem:[%s5589_s1 + $0x10] sm:$0xff]  }
  0x67   : > { %v752_v14 = vand.u32 %v5060_v63, %v676_v12  ;;  %v406_v3 = vsel %vm404_vm14, %v4903_v11, %v405_v15  ;;  %v612_v19 = vsel %vm610_vm15, %v4903_v11, %v405_v15  ;;  %v1383_v29 = vand.u32 %v1312_v16, %v5060_v63  ;;  %v4841_v12 = vld [vmem:[%s5589_s1 + $0x38] sm:$0xff]   ;;  %v4842_v15 = vld [vmem:[%s5589_s1 + $0x80] sm:$0xff]  }
  0x68   : > { %v410_v25 = vsel %vm403_vm0, %v406_v3, %v409_v18  ;;  %v616_v26 = vsel %vm609_vm12, %v612_v19, %v615_v1  ;;  %v1700_v48 = vcombine.high %v5143_v5, %v5143_v5  ;;  %v622_v10 = vmul.f32 %v618_v46, %v5054_v60  ;;  %v4843_v19 = vld [vmem:[%s5589_s1 + $0x88] sm:$0xff]   ;;  %v4864_v46 = vld [vmem:[%s5589_s1 + $0x130] sm:$0xff]  }
  0x69   : > { %760 = vmatprep.subr.bf16.mxu0 %v752_v14  ;;  %v5079_v28 = vsel %vm400_vm1, nan, %v410_v25  ;;  %v5081_v24 = vsel %vm400_vm1, nan, %v616_v26  ;;  %v1704_v60 = vpack.c.bf16 %v5143_v5, %v5143_v5  ;;  %v4844_v26 = vld [vmem:[%s5589_s1 + $0x90] sm:$0xff]   ;;  %v4865_v5 = vld [vmem:[%s5589_s1 + $0x138] sm:$0xff]  }
  0x6a   : > { %761 = vmatpush1.bf16.msra.mxu0 %v749_v13  ;;  %v672_v17 = vcombine.high %v5079_v28, %v5079_v28  ;;  %v677_v30 = vpack.c.bf16 %v5079_v28, %v5079_v28  ;;  %v1308_v32 = vcombine.high %v5081_v24, %v5081_v24  ;;  %v619_v49 = vmul.f32 2.0, %v5079_v28 }
  0x6b   : > { %1062 = vmatprep.subr.bf16.mxu0 %v1054_v7  ;;  %v1705_v50 = vpack.c.bf16 %v1700_v48, %v1700_v48  ;;  %v1313_v56 = vpack.c.bf16 %v5081_v24, %v5081_v24  ;;  %v4840_v7 = vld [vmem:[%s5589_s1 + $0x30] sm:$0xff]   ;;  %v5218_v11 = vsub.f32 1.0, %v622_v10  ;;  %v1773_v16 = vand.u32 %v1704_v60, %v5060_v63 }
  0x6c   : > { %v678_v33 = vpack.c.bf16 %v672_v17, %v672_v17  ;;  %v755_v34 = vand.u32 %v5060_v63, %v677_v30  ;;  %v1314_v38 = vpack.c.bf16 %v1308_v32, %v1308_v32  ;;  %v5158_v51 = vmul.f32 %v619_v49, %v5081_v24  ;;  %v4847_v24 = vld [vmem:[%s5589_s1 + $0xa8] sm:$0xff]   ;;  %v4849_v17 = vld [vmem:[%s5589_s1 + $0xb8] sm:$0xff]  }
  0x6d   : > { %4302 = vmatmul.mubr.msk.bf16.vlgmr.msra.gmra.mrb[0].mxu0 %vm719_vm2, %v4824_v21  ;;  %v1776_v54 = vand.u32 %v1705_v50, %v5060_v63  ;;  %v1386_v59 = vand.u32 %v1313_v56, %v5060_v63  ;;  %v2093_v8 = vcombine.high %v5218_v11, %v5218_v11  ;;  %v623_v9 = vmul.f32 %v619_v49, %v5079_v28  ;;  %v4846_v28 = vld [vmem:[%s5589_s1 + $0xa0] sm:$0xff]  }
  0x6e   : > { %1063 = vmatpush1.bf16.msra.mxu0 %v1051_v27  ;;  %802 = vmatprep.mubr.bf16.mxu0 %v4914_v0  ;;  %v758_v36 = vand.u32 %v5060_v63, %v678_v33  ;;  %v1389_v41 = vand.u32 %v1314_v38, %v5060_v63  ;;  %v1701_v55 = vcombine.high %v5158_v51, %v5158_v51  ;;  %v4845_v27 = vld [vmem:[%s5589_s1 + $0x98] sm:$0xff]   ;;  %v4855_v38 = vld [vmem:[%s5589_s1 + $0xe8] sm:$0xff]  }
  0x6f   : > { %1391 = vmatprep.subr.bf16.mxu0 %v1383_v29  ;;  %v2098_v13 = vpack.c.bf16 %v2093_v8, %v2093_v8  ;;  %v5232_v14 = vsub.f32 1.0, %v623_v9  ;;  %v1706_v20 = vpack.c.bf16 %v5158_v51, %v5158_v51  ;;  %v4848_v29 = vld [vmem:[%s5589_s1 + $0xb0] sm:$0xff]   ;;  %v2097_v30 = vpack.c.bf16 %v5218_v11, %v5218_v11 }
  0x70   : > { %873 = vmatprep.subr.bf16.mxu1 %v758_v36  ;;  %v1707_v57 = vpack.c.bf16 %v1701_v55, %v1701_v55  ;;  %v4852_v36 = vld [vmem:[%s5589_s1 + $0xd0] sm:$0xff]  }
  0x71   : > { %874 = vmatpush1.bf16.msra.mxu1 %v755_v34  ;;  %v2169_v18 = vand.u32 %v2098_v13, %v5060_v63  ;;  %v2094_v1 = vcombine.high %v5232_v14, %v5232_v14  ;;  %v2166_v32 = vand.u32 %v2097_v30, %v5060_v63  ;;  %v2099_v33 = vpack.c.bf16 %v5232_v14, %v5232_v14  ;;  %v4851_v34 = vld [vmem:[%s5589_s1 + $0xc8] sm:$0xff]  }
  0x72   : > { %1175 = vmatprep.subr.bf16.mxu1 %v1060_v37  ;;  %v1782_v22 = vand.u32 %v1707_v57, %v5060_v63  ;;  %v4854_v37 = vld [vmem:[%s5589_s1 + $0xe0] sm:$0xff]  }
  0x73   : > { %v2100_v3 = vpack.c.bf16 %v2094_v1, %v2094_v1  ;;  %v2172_v35 = vand.u32 %v2099_v33, %v5060_v63 }
  0x74   : > { %4310 = vmatmul.mubr.msk.bf16.vlgmr.msra.gmra.mrb[0].mxu1 %vm719_vm2, %v4824_v21  ;;  %v1779_v21 = vand.u32 %v1706_v20, %v5060_v63 }
  0x75   : > { %4303 = vmatmul.mubr.msk.bf16.gmra.mrb[4].mxu0 %vm719_vm2, %v4827_v39  ;;  %1176 = vmatpush1.bf16.msra.mxu1 %v1057_v40  ;;  %v2175_v25 = vand.u32 %v2100_v3, %v5060_v63  ;;  %v4853_v63 = vld [vmem:[%s5589_s1 + $0xd8] sm:$0xff]  }
  0x76   : > { %812 = vmatprep.mubr.bf16.mxu0 %v4914_v0  ;;  %915 = vmatprep.mubr.bf16.mxu1 %v4914_v0  ;;  %v4857_v40 = vld [vmem:[%s5589_s1 + $0xf8] sm:$0xff]  }
  0x77   : > { %1504 = vmatprep.subr.bf16.mxu1 %v1389_v41  ;;  %v4858_v41 = vld [vmem:[%s5589_s1 + $0x100] sm:$0xff]  }
  0x7c   : > { %4311 = vmatmul.mubr.msk.bf16.gmra.mrb[4].mxu1 %vm719_vm2, %v4827_v39  ;;  %v4856_v39 = vld [vmem:[%s5589_s1 + $0xf0] sm:$0xff]  }
  0x7d   : > { %4304 = vmatmul.mubr.msk.bf16.gmra.mrb[8].mxu0 %vm719_vm2, %v4828_v2  ;;  %925 = vmatprep.mubr.bf16.mxu1 %v4914_v0 }
  0x7e   : > { %822 = vmatprep.mubr.bf16.mxu0 %v4914_v0 }
  0x84   : > { %4312 = vmatmul.mubr.msk.bf16.gmra.mrb[8].mxu1 %vm719_vm2, %v4828_v2  ;;  %v4859_v2 = vld [vmem:[%s5589_s1 + $0x108] sm:$0xff]  }
  0x85   : > { %4305 = vmatmul.mubr.msk.bf16.gmra.mrb[12].mxu0 %vm719_vm2, %v4829_v42  ;;  %935 = vmatprep.mubr.bf16.mxu1 %v4914_v0 }
  0x86   : > { %832 = vmatprep.mubr.bf16.mxu0 %v4914_v0 }
  0x8c   : > { %4313 = vmatmul.mubr.msk.bf16.gmra.mrb[12].mxu1 %vm719_vm2, %v4829_v42  ;;  %v4860_v42 = vld [vmem:[%s5589_s1 + $0x110] sm:$0xff]  }
  0x8d   : > { %4306 = vmatmul.mubr.msk.bf16.gmra.mrb[16].mxu0 %vm719_vm2, %v4830_v43  ;;  %945 = vmatprep.mubr.bf16.mxu1 %v4914_v0 }
  0x8e   : > { %842 = vmatprep.mubr.bf16.mxu0 %v4914_v0 }
  0x94   : > { %4314 = vmatmul.mubr.msk.bf16.gmra.mrb[16].mxu1 %vm719_vm2, %v4830_v43  ;;  %v4861_v43 = vld [vmem:[%s5589_s1 + $0x118] sm:$0xff]  }
  0x95   : > { %4307 = vmatmul.mubr.msk.bf16.gmra.mrb[20].mxu0 %vm719_vm2, %v4831_v44  ;;  %955 = vmatprep.mubr.bf16.mxu1 %v4914_v0 }
  0x96   : > { %852 = vmatprep.mubr.bf16.mxu0 %v4914_v0 }
  0x9c   : > { %4315 = vmatmul.mubr.msk.bf16.gmra.mrb[20].mxu1 %vm719_vm2, %v4831_v44  ;;  %v4862_v44 = vld [vmem:[%s5589_s1 + $0x120] sm:$0xff]  }
  0x9d   : > { %4308 = vmatmul.mubr.msk.bf16.gmra.mrb[24].mxu0 %vm719_vm2, %v4832_v45  ;;  %965 = vmatprep.mubr.bf16.mxu1 %v4914_v0 }
  0x9e   : > { %862 = vmatprep.mubr.bf16.mxu0 %v4914_v0 }
  0xa4   : > { %4316 = vmatmul.mubr.msk.bf16.gmra.mrb[24].mxu1 %vm719_vm2, %v4832_v45  ;;  %v4863_v45 = vld [vmem:[%s5589_s1 + $0x128] sm:$0xff]  }
  0xa5   : > { %4309 = vmatmul.mubr.msk.bf16.gmra.mrb[28].mxu0 %vm719_vm2, %v4833_v47  ;;  %975 = vmatprep.mubr.bf16.mxu1 %v4914_v0 }
  0xa6   : > { %1094 = vmatprep.mubr.bf16.mxu0 %v4914_v0 }
  0xac   : > { %4317 = vmatmul.mubr.msk.bf16.gmra.mrb[28].mxu1 %vm719_vm2, %v4833_v47 }
  0xad   : > { %4326 = vmatmul.mubr.msk.bf16.vlgmr.msra.gmra.mrb[0].mxu0 %vm719_vm2, %v4834_v52  ;;  %1207 = vmatprep.mubr.bf16.mxu1 %v4914_v0 }
  0xae   : > { %1392 = vmatpush1.bf16.msra.mxu0 %v1380_v53  ;;  %1104 = vmatprep.mubr.bf16.mxu0 %v4914_v0 }
  0xaf   : > { %1784 = vmatprep.subr.bf16.mxu0 %v1776_v54 }
  0xb4   : > { %4334 = vmatmul.mubr.msk.bf16.vlgmr.msra.gmra.mrb[0].mxu1 %vm719_vm2, %v4834_v52 }
  0xb5   : > { %4327 = vmatmul.mubr.msk.bf16.gmra.mrb[4].mxu0 %vm719_vm2, %v4835_v58  ;;  %1505 = vmatpush1.bf16.msra.mxu1 %v1386_v59 }
  0xb6   : > { %1114 = vmatprep.mubr.bf16.mxu0 %v4914_v0  ;;  %1217 = vmatprep.mubr.bf16.mxu1 %v4914_v0 }
  0xb7   : > { %1897 = vmatprep.subr.bf16.mxu1 %v1782_v22 }
  0xbc   : > { %4335 = vmatmul.mubr.msk.bf16.gmra.mrb[4].mxu1 %vm719_vm2, %v4835_v58 }
  0xbd   : > { %4328 = vmatmul.mubr.msk.bf16.gmra.mrb[8].mxu0 %vm719_vm2, %v4836_v61  ;;  %1227 = vmatprep.mubr.bf16.mxu1 %v4914_v0 }
  0xbe   : > { %1124 = vmatprep.mubr.bf16.mxu0 %v4914_v0 }
  0xc4   : > { %4336 = vmatmul.mubr.msk.bf16.gmra.mrb[8].mxu1 %vm719_vm2, %v4836_v61 }
  0xc5   : > { %4329 = vmatmul.mubr.msk.bf16.gmra.mrb[12].mxu0 %vm719_vm2, %v4837_v62  ;;  %1237 = vmatprep.mubr.bf16.mxu1 %v4914_v0 }
  0xc6   : > { %1134 = vmatprep.mubr.bf16.mxu0 %v4914_v0 }
  0xcc   : > { %4337 = vmatmul.mubr.msk.bf16.gmra.mrb[12].mxu1 %vm719_vm2, %v4837_v62 }
  0xcd   : > { %4330 = vmatmul.mubr.msk.bf16.gmra.mrb[16].mxu0 %vm719_vm2, %v4838_v4  ;;  %1247 = vmatprep.mubr.bf16.mxu1 %v4914_v0 }
  0xce   : > { %1144 = vmatprep.mubr.bf16.mxu0 %v4914_v0 }
  0xd4   : > { %4338 = vmatmul.mubr.msk.bf16.gmra.mrb[16].mxu1 %vm719_vm2, %v4838_v4 }
  0xd5   : > { %4331 = vmatmul.mubr.msk.bf16.gmra.mrb[20].mxu0 %vm719_vm2, %v4839_v6  ;;  %1257 = vmatprep.mubr.bf16.mxu1 %v4914_v0 }
  0xd6   : > { %1154 = vmatprep.mubr.bf16.mxu0 %v4914_v0 }
  0xdc   : > { %4339 = vmatmul.mubr.msk.bf16.gmra.mrb[20].mxu1 %vm719_vm2, %v4839_v6 }
  0xdd   : > { %4332 = vmatmul.mubr.msk.bf16.gmra.mrb[24].mxu0 %vm719_vm2, %v4840_v7  ;;  %1267 = vmatprep.mubr.bf16.mxu1 %v4914_v0 }
  0xde   : > { %1164 = vmatprep.mubr.bf16.mxu0 %v4914_v0 }
  0xe4   : > { %4340 = vmatmul.mubr.msk.bf16.gmra.mrb[24].mxu1 %vm719_vm2, %v4840_v7 }
  0xe5   : > { %4333 = vmatmul.mubr.msk.bf16.gmra.mrb[28].mxu0 %vm719_vm2, %v4841_v12  ;;  %1277 = vmatprep.mubr.bf16.mxu1 %v4914_v0 }
  0xe6   : > { %1423 = vmatprep.mubr.bf16.mxu0 %v4914_v0 }
  0xec   : > { %4341 = vmatmul.mubr.msk.bf16.gmra.mrb[28].mxu1 %vm719_vm2, %v4841_v12 }
  0xed   : > { %4366 = vmatmul.mubr.msk.bf16.vlgmr.msra.gmra.mrb[0].mxu0 %vm719_vm2, %v4842_v15  ;;  %1536 = vmatprep.mubr.bf16.mxu1 %v4914_v0 }
  0xee   : > { %1785 = vmatpush1.bf16.msra.mxu0 %v1773_v16  ;;  %1433 = vmatprep.mubr.bf16.mxu0 %v4914_v0 }
  0xef   : > { %2177 = vmatprep.subr.bf16.mxu0 %v2169_v18 }
  0xf4   : > { %4374 = vmatmul.mubr.msk.bf16.vlgmr.msra.gmra.mrb[0].mxu1 %vm719_vm2, %v4842_v15 }
  0xf5   : > { %4367 = vmatmul.mubr.msk.bf16.gmra.mrb[4].mxu0 %vm719_vm2, %v4843_v19  ;;  %1898 = vmatpush1.bf16.msra.mxu1 %v1779_v21 }
  0xf6   : > { %1443 = vmatprep.mubr.bf16.mxu0 %v4914_v0  ;;  %1546 = vmatprep.mubr.bf16.mxu1 %v4914_v0 }
  0xf7   : > { %2290 = vmatprep.subr.bf16.mxu1 %v2175_v25 }
  0xfc   : > { %4375 = vmatmul.mubr.msk.bf16.gmra.mrb[4].mxu1 %vm719_vm2, %v4843_v19 }
  0xfd   : > { %4368 = vmatmul.mubr.msk.bf16.gmra.mrb[8].mxu0 %vm719_vm2, %v4844_v26  ;;  %1556 = vmatprep.mubr.bf16.mxu1 %v4914_v0 }
  0xfe   : > { %1453 = vmatprep.mubr.bf16.mxu0 %v4914_v0 }
 0x104   : > { %4376 = vmatmul.mubr.msk.bf16.gmra.mrb[8].mxu1 %vm719_vm2, %v4844_v26 }
 0x105   : > { %4369 = vmatmul.mubr.msk.bf16.gmra.mrb[12].mxu0 %vm719_vm2, %v4845_v27  ;;  %1566 = vmatprep.mubr.bf16.mxu1 %v4914_v0 }
 0x106   : > { %1463 = vmatprep.mubr.bf16.mxu0 %v4914_v0 }
 0x10c   : > { %4377 = vmatmul.mubr.msk.bf16.gmra.mrb[12].mxu1 %vm719_vm2, %v4845_v27 }
 0x10d   : > { %4370 = vmatmul.mubr.msk.bf16.gmra.mrb[16].mxu0 %vm719_vm2, %v4846_v28  ;;  %1576 = vmatprep.mubr.bf16.mxu1 %v4914_v0 }
 0x10e   : > { %1473 = vmatprep.mubr.bf16.mxu0 %v4914_v0 }
 0x114   : > { %4378 = vmatmul.mubr.msk.bf16.gmra.mrb[16].mxu1 %vm719_vm2, %v4846_v28 }
 0x115   : > { %4371 = vmatmul.mubr.msk.bf16.gmra.mrb[20].mxu0 %vm719_vm2, %v4847_v24  ;;  %1586 = vmatprep.mubr.bf16.mxu1 %v4914_v0 }
 0x116   : > { %1483 = vmatprep.mubr.bf16.mxu0 %v4914_v0 }
 0x11c   : > { %4379 = vmatmul.mubr.msk.bf16.gmra.mrb[20].mxu1 %vm719_vm2, %v4847_v24 }
 0x11d   : > { %4372 = vmatmul.mubr.msk.bf16.gmra.mrb[24].mxu0 %vm719_vm2, %v4848_v29  ;;  %1596 = vmatprep.mubr.bf16.mxu1 %v4914_v0 }
 0x11e   : > { %1493 = vmatprep.mubr.bf16.mxu0 %v4914_v0 }
 0x124   : > { %4380 = vmatmul.mubr.msk.bf16.gmra.mrb[24].mxu1 %vm719_vm2, %v4848_v29 }
 0x125   : > { %4373 = vmatmul.mubr.msk.bf16.gmra.mrb[28].mxu0 %vm719_vm2, %v4849_v17  ;;  %1606 = vmatprep.mubr.bf16.mxu1 %v4914_v0 }
 0x126   : > { %1816 = vmatprep.mubr.bf16.mxu0 %v4914_v0 }
 0x12c   : > { %4381 = vmatmul.mubr.msk.bf16.gmra.mrb[28].mxu1 %vm719_vm2, %v4849_v17 }
 0x12d   : > { %4406 = vmatmul.mubr.msk.bf16.vlgmr.msra.gmra.mrb[0].mxu0 %vm719_vm2, %v4850_v31  ;;  %1929 = vmatprep.mubr.bf16.mxu1 %v4914_v0 }
 0x12e   : > { %2178 = vmatpush1.bf16.msra.mxu0 %v2166_v32  ;;  %1826 = vmatprep.mubr.bf16.mxu0 %v4914_v0 }
 0x134   : > { %4414 = vmatmul.mubr.msk.bf16.vlgmr.msra.gmra.mrb[0].mxu1 %vm719_vm2, %v4850_v31 }
 0x135   : > { %4407 = vmatmul.mubr.msk.bf16.gmra.mrb[4].mxu0 %vm719_vm2, %v4851_v34  ;;  %2291 = vmatpush1.bf16.msra.mxu1 %v2172_v35 }
 0x136   : > { %1836 = vmatprep.mubr.bf16.mxu0 %v4914_v0  ;;  %1939 = vmatprep.mubr.bf16.mxu1 %v4914_v0 }
 0x13c   : > { %4415 = vmatmul.mubr.msk.bf16.gmra.mrb[4].mxu1 %vm719_vm2, %v4851_v34 }
 0x13d   : > { %4408 = vmatmul.mubr.msk.bf16.gmra.mrb[8].mxu0 %vm719_vm2, %v4852_v36  ;;  %1949 = vmatprep.mubr.bf16.mxu1 %v4914_v0 }
 0x13e   : > { %1846 = vmatprep.mubr.bf16.mxu0 %v4914_v0 }
 0x144   : > { %4416 = vmatmul.mubr.msk.bf16.gmra.mrb[8].mxu1 %vm719_vm2, %v4852_v36 }
 0x145   : > { %4409 = vmatmul.mubr.msk.bf16.gmra.mrb[12].mxu0 %vm719_vm2, %v4853_v63  ;;  %1959 = vmatprep.mubr.bf16.mxu1 %v4914_v0 }
 0x146   : > { %1856 = vmatprep.mubr.bf16.mxu0 %v4914_v0 }
 0x14c   : > { %4417 = vmatmul.mubr.msk.bf16.gmra.mrb[12].mxu1 %vm719_vm2, %v4853_v63 }
 0x14d   : > { %4410 = vmatmul.mubr.msk.bf16.gmra.mrb[16].mxu0 %vm719_vm2, %v4854_v37  ;;  %1969 = vmatprep.mubr.bf16.mxu1 %v4914_v0 }
 0x14e   : > { %1866 = vmatprep.mubr.bf16.mxu0 %v4914_v0 }
 0x154   : > { %4418 = vmatmul.mubr.msk.bf16.gmra.mrb[16].mxu1 %vm719_vm2, %v4854_v37 }
 0x155   : > { %4411 = vmatmul.mubr.msk.bf16.gmra.mrb[20].mxu0 %vm719_vm2, %v4855_v38  ;;  %1979 = vmatprep.mubr.bf16.mxu1 %v4914_v0 }
 0x156   : > { %1876 = vmatprep.mubr.bf16.mxu0 %v4914_v0 }
 0x15c   : > { %4419 = vmatmul.mubr.msk.bf16.gmra.mrb[20].mxu1 %vm719_vm2, %v4855_v38 }
 0x15d   : > { %4412 = vmatmul.mubr.msk.bf16.gmra.mrb[24].mxu0 %vm719_vm2, %v4856_v39  ;;  %1989 = vmatprep.mubr.bf16.mxu1 %v4914_v0 }
 0x15e   : > { %1886 = vmatprep.mubr.bf16.mxu0 %v4914_v0 }
 0x164   : > { %4420 = vmatmul.mubr.msk.bf16.gmra.mrb[24].mxu1 %vm719_vm2, %v4856_v39 }
 0x165   : > { %4413 = vmatmul.mubr.msk.bf16.gmra.mrb[28].mxu0 %vm719_vm2, %v4857_v40  ;;  %1999 = vmatprep.mubr.bf16.mxu1 %v4914_v0 }
 0x166   : > { %2209 = vmatprep.mubr.bf16.mxu0 %v4914_v0 }
 0x16c   : > { %4421 = vmatmul.mubr.msk.bf16.gmra.mrb[28].mxu1 %vm719_vm2, %v4857_v40 }
 0x16d   : > { %4446 = vmatmul.mubr.msk.bf16.vlgmr.msra.gmra.mrb[0].mxu0 %vm719_vm2, %v4858_v41  ;;  %2322 = vmatprep.mubr.bf16.mxu1 %v4914_v0 }
 0x16e   : > { %2219 = vmatprep.mubr.bf16.mxu0 %v4914_v0 }
 0x174   : > { %4454 = vmatmul.mubr.msk.bf16.vlgmr.msra.gmra.mrb[0].mxu1 %vm719_vm2, %v4858_v41 }
 0x175   : > { %4447 = vmatmul.mubr.msk.bf16.gmra.mrb[4].mxu0 %vm719_vm2, %v4859_v2  ;;  %2332 = vmatprep.mubr.bf16.mxu1 %v4914_v0 }
 0x176   : > { %2229 = vmatprep.mubr.bf16.mxu0 %v4914_v0 }
 0x17c   : > { %4455 = vmatmul.mubr.msk.bf16.gmra.mrb[4].mxu1 %vm719_vm2, %v4859_v2 }
 0x17d   : > { %4448 = vmatmul.mubr.msk.bf16.gmra.mrb[8].mxu0 %vm719_vm2, %v4860_v42  ;;  %2342 = vmatprep.mubr.bf16.mxu1 %v4914_v0 }
 0x17e   : > { %2239 = vmatprep.mubr.bf16.mxu0 %v4914_v0 }
 0x184   : > { %4456 = vmatmul.mubr.msk.bf16.gmra.mrb[8].mxu1 %vm719_vm2, %v4860_v42 }
 0x185   : > { %4449 = vmatmul.mubr.msk.bf16.gmra.mrb[12].mxu0 %vm719_vm2, %v4861_v43  ;;  %2352 = vmatprep.mubr.bf16.mxu1 %v4914_v0 }
 0x186   : > { %2249 = vmatprep.mubr.bf16.mxu0 %v4914_v0 }
 0x18c   : > { %4457 = vmatmul.mubr.msk.bf16.gmra.mrb[12].mxu1 %vm719_vm2, %v4861_v43 }
 0x18d   : > { %4450 = vmatmul.mubr.msk.bf16.gmra.mrb[16].mxu0 %vm719_vm2, %v4862_v44  ;;  %2362 = vmatprep.mubr.bf16.mxu1 %v4914_v0 }
 0x18e   : > { %2259 = vmatprep.mubr.bf16.mxu0 %v4914_v0 }
 0x194   : > { %4458 = vmatmul.mubr.msk.bf16.gmra.mrb[16].mxu1 %vm719_vm2, %v4862_v44 }
 0x195   : > { %4451 = vmatmul.mubr.msk.bf16.gmra.mrb[20].mxu0 %vm719_vm2, %v4863_v45  ;;  %2372 = vmatprep.mubr.bf16.mxu1 %v4914_v0 }
 0x196   : > { %2269 = vmatprep.mubr.bf16.mxu0 %v4914_v0 }
 0x19c   : > { %4459 = vmatmul.mubr.msk.bf16.gmra.mrb[20].mxu1 %vm719_vm2, %v4863_v45 }
 0x19d   : > { %4452 = vmatmul.mubr.msk.bf16.gmra.mrb[24].mxu0 %vm719_vm2, %v4864_v46  ;;  %2382 = vmatprep.mubr.bf16.mxu1 %v4914_v0 }
 0x19e   : > { %2279 = vmatprep.mubr.bf16.mxu0 %v4914_v0 }
 0x1a4   : > { %4460 = vmatmul.mubr.msk.bf16.gmra.mrb[24].mxu1 %vm719_vm2, %v4864_v46 }
 0x1a5   : > { %4453 = vmatmul.mubr.msk.bf16.gmra.mrb[28].mxu0 %vm719_vm2, %v4865_v5  ;;  %2392 = vmatprep.mubr.bf16.mxu1 %v4914_v0 }
 0x1a6   : > { %2659 = vmatprep.mubr.bf16.mxu0 %v4914_v0 }
 0x1ac   : > { %4461 = vmatmul.mubr.msk.bf16.gmra.mrb[28].mxu1 %vm719_vm2, %v4865_v5 }
 0x1ad   : > { %2772 = vmatprep.mubr.bf16.mxu1 %v4914_v0 }
 0x240   : > { %v2211_v47 = vpop.f32.mrb[0].mxu0 }
 0x241   : > { %v2213_v48 = vpop.f32.mrb[1].mxu0  ;;  %v2467_v23 = vmax.f32 %v2211_v47, 0.0 }
 0x242   : > { %v2215_v49 = vpop.f32.mrb[2].mxu0  ;;  %v2468_v52 = vmax.f32 %v2213_v48, 0.0 }
 0x243   : > { %v2471_v50 = vmax.f32 %v2215_v49, 0.0  ;;  %v2217_v51 = vpop.f32.mrb[3].mxu0 }
 0x244   : > { %v2472_v53 = vmax.f32 %v2217_v51, 0.0 }
 0x245   : > { %v2547_v54 = vpack.c.bf16 %v2471_v50, %v2467_v23 }
 0x246   : > { %v2548_v55 = vpack.c.bf16 %v2472_v53, %v2468_v52 }
 0x247   : > { %v2324_v57 = vpop.f32.mrb[0].mxu1 }
 0x248   : > { %v2221_v56 = vpop.f32.mrb[4].mxu0  ;;  %2627 = vmatprep.subr.bf16.mxu0 %v2548_v55  ;;  %v2326_v59 = vpop.f32.mrb[1].mxu1  ;;  %v2469_v7 = vmax.f32 %v2324_v57, 0.0 }
 0x249   : > { %v2223_v58 = vpop.f32.mrb[5].mxu0  ;;  %2628 = vmatpush1.bf16.msra.mxu0 %v2547_v54  ;;  %v2328_v61 = vpop.f32.mrb[2].mxu1  ;;  %v2475_v62 = vmax.f32 %v2221_v56, 0.0  ;;  %v2470_v9 = vmax.f32 %v2326_v59, 0.0 }
 0x24a   : > { %v2225_v22 = vpop.f32.mrb[6].mxu0  ;;  %v2473_v10 = vmax.f32 %v2328_v61, 0.0  ;;  %v2330_v11 = vpop.f32.mrb[3].mxu1  ;;  %v2476_v12 = vmax.f32 %v2223_v58, 0.0 }
 0x24b   : > { %v2479_v4 = vmax.f32 %v2225_v22, 0.0  ;;  %v2227_v6 = vpop.f32.mrb[7].mxu0  ;;  %v2474_v60 = vmax.f32 %v2330_v11, 0.0 }
 0x24c   : > { %v2480_v8 = vmax.f32 %v2227_v6, 0.0  ;;  %v2549_v14 = vpack.c.bf16 %v2473_v10, %v2469_v7 }
 0x24d   : > { %v2551_v13 = vpack.c.bf16 %v2479_v4, %v2475_v62  ;;  %v2550_v16 = vpack.c.bf16 %v2474_v60, %v2470_v9 }
 0x24e   : > { %v2552_v15 = vpack.c.bf16 %v2480_v8, %v2476_v12 }
 0x24f   : > { %v2334_v1 = vpop.f32.mrb[4].mxu1  ;;  %2740 = vmatprep.subr.bf16.mxu1 %v2550_v16 }
 0x250   : > { %v2231_v18 = vpop.f32.mrb[8].mxu0  ;;  %2629 = vmatprep.subr.bf16.mxu0 %v2552_v15  ;;  %v2336_v3 = vpop.f32.mrb[5].mxu1  ;;  %2741 = vmatpush1.bf16.msra.mxu1 %v2549_v14  ;;  %v2477_v28 = vmax.f32 %v2334_v1, 0.0 }
 0x251   : > { %v2233_v20 = vpop.f32.mrb[9].mxu0  ;;  %2630 = vmatpush1.bf16.msra.mxu0 %v2551_v13  ;;  %v2338_v21 = vpop.f32.mrb[6].mxu1  ;;  %v2483_v25 = vmax.f32 %v2231_v18, 0.0  ;;  %v2478_v31 = vmax.f32 %v2336_v3, 0.0 }
 0x252   : > { %v2235_v19 = vpop.f32.mrb[10].mxu0  ;;  %v2481_v24 = vmax.f32 %v2338_v21, 0.0  ;;  %v2340_v29 = vpop.f32.mrb[7].mxu1  ;;  %v2484_v17 = vmax.f32 %v2233_v20, 0.0 }
 0x253   : > { %v2487_v26 = vmax.f32 %v2235_v19, 0.0  ;;  %v2237_v27 = vpop.f32.mrb[11].mxu0  ;;  %v2482_v32 = vmax.f32 %v2340_v29, 0.0 }
 0x254   : > { %v2488_v30 = vmax.f32 %v2237_v27, 0.0  ;;  %v2553_v34 = vpack.c.bf16 %v2481_v24, %v2477_v28 }
 0x255   : > { %v2555_v33 = vpack.c.bf16 %v2487_v26, %v2483_v25  ;;  %v2554_v36 = vpack.c.bf16 %v2482_v32, %v2478_v31 }
 0x256   : > { %v2556_v35 = vpack.c.bf16 %v2488_v30, %v2484_v17 }
 0x257   : > { %v2344_v37 = vpop.f32.mrb[8].mxu1  ;;  %2742 = vmatprep.subr.bf16.mxu1 %v2554_v36 }
 0x258   : > { %v2241_v63 = vpop.f32.mrb[12].mxu0  ;;  %2631 = vmatprep.subr.bf16.mxu0 %v2556_v35  ;;  %v2346_v39 = vpop.f32.mrb[9].mxu1  ;;  %2743 = vmatpush1.bf16.msra.mxu1 %v2553_v34  ;;  %v2485_v44 = vmax.f32 %v2344_v37, 0.0 }
 0x259   : > { %v2243_v38 = vpop.f32.mrb[13].mxu0  ;;  %2632 = vmatpush1.bf16.msra.mxu0 %v2555_v33  ;;  %v2348_v41 = vpop.f32.mrb[10].mxu1  ;;  %v2491_v2 = vmax.f32 %v2241_v63, 0.0  ;;  %v2486_v48 = vmax.f32 %v2346_v39, 0.0 }
 0x25a   : > { %v2245_v40 = vpop.f32.mrb[14].mxu0  ;;  %v2489_v45 = vmax.f32 %v2348_v41, 0.0  ;;  %v2350_v46 = vpop.f32.mrb[11].mxu1  ;;  %v2492_v5 = vmax.f32 %v2243_v38, 0.0 }
 0x25b   : > { %v2495_v42 = vmax.f32 %v2245_v40, 0.0  ;;  %v2247_v43 = vpop.f32.mrb[15].mxu0  ;;  %v2490_v49 = vmax.f32 %v2350_v46, 0.0 }
 0x25c   : > { %v2496_v47 = vmax.f32 %v2247_v43, 0.0  ;;  %v2557_v50 = vpack.c.bf16 %v2489_v45, %v2485_v44 }
 0x25d   : > { %v2559_v23 = vpack.c.bf16 %v2495_v42, %v2491_v2  ;;  %v2558_v52 = vpack.c.bf16 %v2490_v49, %v2486_v48 }
 0x25e   : > { %v2560_v51 = vpack.c.bf16 %v2496_v47, %v2492_v5 }
 0x25f   : > { %v2354_v54 = vpop.f32.mrb[12].mxu1  ;;  %2744 = vmatprep.subr.bf16.mxu1 %v2558_v52 }
 0x260   : > { %v2251_v53 = vpop.f32.mrb[16].mxu0  ;;  %2633 = vmatprep.subr.bf16.mxu0 %v2560_v51  ;;  %v2356_v56 = vpop.f32.mrb[13].mxu1  ;;  %2745 = vmatpush1.bf16.msra.mxu1 %v2557_v50  ;;  %v2493_v62 = vmax.f32 %v2354_v54, 0.0 }
 0x261   : > { %v2253_v55 = vpop.f32.mrb[17].mxu0  ;;  %2634 = vmatpush1.bf16.msra.mxu0 %v2559_v23  ;;  %v2358_v58 = vpop.f32.mrb[14].mxu1  ;;  %v2499_v59 = vmax.f32 %v2251_v53, 0.0  ;;  %v2494_v11 = vmax.f32 %v2356_v56, 0.0 }
 0x262   : > { %v2255_v57 = vpop.f32.mrb[18].mxu0  ;;  %v2497_v4 = vmax.f32 %v2358_v58, 0.0  ;;  %v2360_v6 = vpop.f32.mrb[15].mxu1  ;;  %v2500_v7 = vmax.f32 %v2253_v55, 0.0 }
 0x263   : > { %v2503_v22 = vmax.f32 %v2255_v57, 0.0  ;;  %v2257_v61 = vpop.f32.mrb[19].mxu0  ;;  %v2498_v12 = vmax.f32 %v2360_v6, 0.0 }
 0x264   : > { %v2504_v10 = vmax.f32 %v2257_v61, 0.0  ;;  %v2561_v9 = vpack.c.bf16 %v2497_v4, %v2493_v62 }
 0x265   : > { %v2563_v8 = vpack.c.bf16 %v2503_v22, %v2499_v59  ;;  %v2562_v13 = vpack.c.bf16 %v2498_v12, %v2494_v11 }
 0x266   : > { %v2564_v60 = vpack.c.bf16 %v2504_v10, %v2500_v7 }
 0x267   : > { %v2364_v15 = vpop.f32.mrb[16].mxu1  ;;  %2746 = vmatprep.subr.bf16.mxu1 %v2562_v13 }
 0x268   : > { %v2261_v14 = vpop.f32.mrb[20].mxu0  ;;  %2635 = vmatprep.subr.bf16.mxu0 %v2564_v60  ;;  %v2366_v18 = vpop.f32.mrb[17].mxu1  ;;  %2747 = vmatpush1.bf16.msra.mxu1 %v2561_v9  ;;  %v2501_v25 = vmax.f32 %v2364_v15, 0.0  ;;  %v4866_v9 = vld [vmem:[%s5590_s2] sm:$0xff]  }
 0x269   : > { %v2263_v16 = vpop.f32.mrb[21].mxu0  ;;  %2636 = vmatpush1.bf16.msra.mxu0 %v2563_v8  ;;  %v2368_v20 = vpop.f32.mrb[18].mxu1  ;;  %v2507_v3 = vmax.f32 %v2261_v14, 0.0  ;;  %v2502_v29 = vmax.f32 %v2366_v18, 0.0 }
 0x26a   : > { %v2265_v1 = vpop.f32.mrb[22].mxu0  ;;  %v2505_v26 = vmax.f32 %v2368_v20, 0.0  ;;  %v2370_v27 = vpop.f32.mrb[19].mxu1  ;;  %v2508_v28 = vmax.f32 %v2263_v16, 0.0 }
 0x26b   : > { %v2511_v19 = vmax.f32 %v2265_v1, 0.0  ;;  %v2267_v21 = vpop.f32.mrb[23].mxu0  ;;  %v2506_v17 = vmax.f32 %v2370_v27, 0.0  ;;  %v4870_v27 = vld [vmem:[%s5590_s2 + $0x20] sm:$0xff]  }
 0x26c   : > { %v2512_v24 = vmax.f32 %v2267_v21, 0.0  ;;  %v2565_v31 = vpack.c.bf16 %v2505_v26, %v2501_v25  ;;  %v4867_v21 = vld [vmem:[%s5590_s2 + $0x8] sm:$0xff]   ;;  %v4868_v25 = vld [vmem:[%s5590_s2 + $0x10] sm:$0xff]   ;;  %v4869_v26 = vld [vmem:[%s5590_s2 + $0x18] sm:$0xff]  }
 0x26d   : > { %v2567_v30 = vpack.c.bf16 %v2511_v19, %v2507_v3  ;;  %v2566_v33 = vpack.c.bf16 %v2506_v17, %v2502_v29  ;;  %v4873_v29 = vld [vmem:[%s5590_s2 + $0x38] sm:$0xff]  }
 0x26e   : > { %v2568_v32 = vpack.c.bf16 %v2512_v24, %v2508_v28  ;;  %v4871_v28 = vld [vmem:[%s5590_s2 + $0x28] sm:$0xff]   ;;  %v4872_v24 = vld [vmem:[%s5590_s2 + $0x30] sm:$0xff]  }
 0x26f   : > { %v2374_v35 = vpop.f32.mrb[20].mxu1  ;;  %2748 = vmatprep.subr.bf16.mxu1 %v2566_v33 }
 0x270   : > { %v2271_v34 = vpop.f32.mrb[24].mxu0  ;;  %2637 = vmatprep.subr.bf16.mxu0 %v2568_v32  ;;  %v2376_v63 = vpop.f32.mrb[21].mxu1  ;;  %2749 = vmatpush1.bf16.msra.mxu1 %v2565_v31  ;;  %v2509_v2 = vmax.f32 %v2374_v35, 0.0 }
 0x271   : > { %v2273_v36 = vpop.f32.mrb[25].mxu0  ;;  %2638 = vmatpush1.bf16.msra.mxu0 %v2567_v30  ;;  %v2378_v38 = vpop.f32.mrb[22].mxu1  ;;  %v2515_v39 = vmax.f32 %v2271_v34, 0.0  ;;  %v2510_v46 = vmax.f32 %v2376_v63, 0.0 }
 0x272   : > { %v2275_v37 = vpop.f32.mrb[26].mxu0  ;;  %v2513_v42 = vmax.f32 %v2378_v38, 0.0  ;;  %v2380_v43 = vpop.f32.mrb[23].mxu1  ;;  %v2516_v44 = vmax.f32 %v2273_v36, 0.0 }
 0x273   : > { %v2519_v40 = vmax.f32 %v2275_v37, 0.0  ;;  %v2277_v41 = vpop.f32.mrb[27].mxu0  ;;  %v2514_v5 = vmax.f32 %v2380_v43, 0.0 }
 0x274   : > { %v2520_v45 = vmax.f32 %v2277_v41, 0.0  ;;  %v2569_v48 = vpack.c.bf16 %v2513_v42, %v2509_v2 }
 0x275   : > { %v2571_v47 = vpack.c.bf16 %v2519_v40, %v2515_v39  ;;  %v2570_v23 = vpack.c.bf16 %v2514_v5, %v2510_v46 }
 0x276   : > { %v2572_v49 = vpack.c.bf16 %v2520_v45, %v2516_v44 }
 0x277   : > { %v2384_v51 = vpop.f32.mrb[24].mxu1  ;;  %2750 = vmatprep.subr.bf16.mxu1 %v2570_v23 }
 0x278   : > { %v2281_v50 = vpop.f32.mrb[28].mxu0  ;;  %2639 = vmatprep.subr.bf16.mxu0 %v2572_v49  ;;  %v2386_v53 = vpop.f32.mrb[25].mxu1  ;;  %2751 = vmatpush1.bf16.msra.mxu1 %v2569_v48  ;;  %v2517_v59 = vmax.f32 %v2384_v51, 0.0 }
 0x279   : > { %v2283_v52 = vpop.f32.mrb[29].mxu0  ;;  %2640 = vmatpush1.bf16.msra.mxu0 %v2571_v47  ;;  %v2388_v55 = vpop.f32.mrb[26].mxu1  ;;  %v2523_v56 = vmax.f32 %v2281_v50, 0.0  ;;  %v2518_v6 = vmax.f32 %v2386_v53, 0.0 }
 0x27a   : > { %v2285_v54 = vpop.f32.mrb[30].mxu0  ;;  %v2521_v22 = vmax.f32 %v2388_v55, 0.0  ;;  %v2390_v61 = vpop.f32.mrb[27].mxu1  ;;  %v2524_v62 = vmax.f32 %v2283_v52, 0.0 }
 0x27b   : > { %v2527_v57 = vmax.f32 %v2285_v54, 0.0  ;;  %v2287_v58 = vpop.f32.mrb[31].mxu0  ;;  %v2522_v7 = vmax.f32 %v2390_v61, 0.0 }
 0x27c   : > { %v2528_v4 = vmax.f32 %v2287_v58, 0.0  ;;  %v2573_v11 = vpack.c.bf16 %v2521_v22, %v2517_v59 }
 0x27d   : > { %v2575_v10 = vpack.c.bf16 %v2527_v57, %v2523_v56  ;;  %v2574_v8 = vpack.c.bf16 %v2522_v7, %v2518_v6 }
 0x27e   : > { %v2576_v12 = vpack.c.bf16 %v2528_v4, %v2524_v62 }
 0x27f   : > { %v2394_v60 = vpop.f32.mrb[28].mxu1  ;;  %2752 = vmatprep.subr.bf16.mxu1 %v2574_v8 }
 0x280   : > { %2641 = vmatprep.subr.bf16.mxu0 %v2576_v12  ;;  %v2396_v13 = vpop.f32.mrb[29].mxu1  ;;  %2753 = vmatpush1.bf16.msra.mxu1 %v2573_v11  ;;  %v2525_v15 = vmax.f32 %v2394_v60, 0.0 }
 0x281   : > { %2642 = vmatpush1.bf16.msra.mxu0 %v2575_v10  ;;  %v2398_v14 = vpop.f32.mrb[30].mxu1  ;;  %v2526_v1 = vmax.f32 %v2396_v13, 0.0 }
 0x282   : > { %v2529_v16 = vmax.f32 %v2398_v14, 0.0  ;;  %v2400_v18 = vpop.f32.mrb[31].mxu1 }
 0x283   : > { %v2530_v20 = vmax.f32 %v2400_v18, 0.0 }
 0x284   : > { %2660 = vmatmul.mubr.bf16.vlgmr.msra.gmra.mrb[32].mxu0 %v4866_v9  ;;  %v2577_v3 = vpack.c.bf16 %v2529_v16, %v2525_v15 }
 0x285   : > { %2669 = vmatprep.mubr.bf16.mxu0 %v4914_v0  ;;  %v2578_v19 = vpack.c.bf16 %v2530_v20, %v2526_v1 }
 0x287   : > { %2754 = vmatprep.subr.bf16.mxu1 %v2578_v19 }
 0x288   : > { %2755 = vmatpush1.bf16.msra.mxu1 %v2577_v3 }
 0x28b   : > { %2773 = vmatmul.mubr.bf16.vlgmr.msra.gmra.mrb[32].mxu1 %v4866_v9 }
 0x28c   : > { %2670 = vmatmul.mubr.bf16.gmra.mrb[36].mxu0 %v4867_v21  ;;  %2782 = vmatprep.mubr.bf16.mxu1 %v4914_v0 }
 0x28d   : > { %2679 = vmatprep.mubr.bf16.mxu0 %v4914_v0 }
 0x293   : > { %2783 = vmatmul.mubr.bf16.gmra.mrb[36].mxu1 %v4867_v21 }
 0x294   : > { %2680 = vmatmul.mubr.bf16.gmra.mrb[40].mxu0 %v4868_v25  ;;  %2792 = vmatprep.mubr.bf16.mxu1 %v4914_v0 }
 0x295   : > { %2689 = vmatprep.mubr.bf16.mxu0 %v4914_v0 }
 0x29b   : > { %2793 = vmatmul.mubr.bf16.gmra.mrb[40].mxu1 %v4868_v25 }
 0x29c   : > { %2690 = vmatmul.mubr.bf16.gmra.mrb[44].mxu0 %v4869_v26  ;;  %2802 = vmatprep.mubr.bf16.mxu1 %v4914_v0 }
 0x29d   : > { %2699 = vmatprep.mubr.bf16.mxu0 %v4914_v0 }
 0x2a3   : > { %2803 = vmatmul.mubr.bf16.gmra.mrb[44].mxu1 %v4869_v26 }
 0x2a4   : > { %2700 = vmatmul.mubr.bf16.gmra.mrb[48].mxu0 %v4870_v27  ;;  %2812 = vmatprep.mubr.bf16.mxu1 %v4914_v0 }
 0x2a5   : > { %2709 = vmatprep.mubr.bf16.mxu0 %v4914_v0 }
 0x2ab   : > { %2813 = vmatmul.mubr.bf16.gmra.mrb[48].mxu1 %v4870_v27 }
 0x2ac   : > { %2710 = vmatmul.mubr.bf16.gmra.mrb[52].mxu0 %v4871_v28  ;;  %2822 = vmatprep.mubr.bf16.mxu1 %v4914_v0 }
 0x2ad   : > { %2719 = vmatprep.mubr.bf16.mxu0 %v4914_v0 }
 0x2b3   : > { %2823 = vmatmul.mubr.bf16.gmra.mrb[52].mxu1 %v4871_v28 }
 0x2b4   : > { %2720 = vmatmul.mubr.bf16.gmra.mrb[56].mxu0 %v4872_v24  ;;  %2832 = vmatprep.mubr.bf16.mxu1 %v4914_v0 }
 0x2b5   : > { %2729 = vmatprep.mubr.bf16.mxu0 %v4914_v0 }
 0x2bb   : > { %2833 = vmatmul.mubr.bf16.gmra.mrb[56].mxu1 %v4872_v24 }
 0x2bc   : > { %2730 = vmatmul.mubr.bf16.gmra.mrb[60].mxu0 %v4873_v29  ;;  %2842 = vmatprep.mubr.bf16.mxu1 %v4914_v0 }
 0x2bd   : > { %3046 = vmatprep.mubr.bf16.mxu0 %v4914_v0 }
 0x2c3   : > { %2843 = vmatmul.mubr.bf16.gmra.mrb[60].mxu1 %v4873_v29 }
 0x2c4   : > { %3159 = vmatprep.mubr.bf16.mxu1 %v4914_v0 }
 0x357   : > { %v2661_v17 = vpop.f32.mrb[32].mxu0 }
 0x358   : > { %v2663_v30 = vpop.f32.mrb[33].mxu0  ;;  %v2853_v32 = vmax.f32 %v2661_v17, 0.0 }
 0x359   : > { %v2665_v31 = vpop.f32.mrb[34].mxu0  ;;  %v2854_v35 = vmax.f32 %v2663_v30, 0.0 }
 0x35a   : > { %v2857_v33 = vmax.f32 %v2665_v31, 0.0  ;;  %v2667_v34 = vpop.f32.mrb[35].mxu0 }
 0x35b   : > { %v2858_v36 = vmax.f32 %v2667_v34, 0.0 }
 0x35c   : > { %v2934_v63 = vpack.c.bf16 %v2857_v33, %v2853_v32 }
 0x35d   : > { %v2935_v37 = vpack.c.bf16 %v2858_v36, %v2854_v35 }
 0x35e   : > { %v2774_v39 = vpop.f32.mrb[32].mxu1 }
 0x35f   : > { %v2671_v38 = vpop.f32.mrb[36].mxu0  ;;  %3014 = vmatprep.subr.bf16.mxu0 %v2935_v37  ;;  %v2855_v41 = vmax.f32 %v2774_v39, 0.0  ;;  %v2776_v2 = vpop.f32.mrb[33].mxu1 }
 0x360   : > { %v2673_v40 = vpop.f32.mrb[37].mxu0  ;;  %3015 = vmatpush1.bf16.msra.mxu0 %v2934_v63  ;;  %v2778_v43 = vpop.f32.mrb[34].mxu1  ;;  %v2861_v44 = vmax.f32 %v2671_v38, 0.0  ;;  %v2856_v23 = vmax.f32 %v2776_v2, 0.0 }
 0x361   : > { %v2675_v42 = vpop.f32.mrb[38].mxu0  ;;  %v2859_v5 = vmax.f32 %v2778_v43, 0.0  ;;  %v2780_v47 = vpop.f32.mrb[35].mxu1  ;;  %v2862_v48 = vmax.f32 %v2673_v40, 0.0 }
 0x362   : > { %v2865_v45 = vmax.f32 %v2675_v42, 0.0  ;;  %v2677_v46 = vpop.f32.mrb[39].mxu0  ;;  %v2860_v50 = vmax.f32 %v2780_v47, 0.0 }
 0x363   : > { %v2866_v49 = vmax.f32 %v2677_v46, 0.0  ;;  %v2936_v52 = vpack.c.bf16 %v2859_v5, %v2855_v41 }
 0x364   : > { %v2938_v51 = vpack.c.bf16 %v2865_v45, %v2861_v44  ;;  %v2937_v54 = vpack.c.bf16 %v2860_v50, %v2856_v23 }
 0x365   : > { %v2939_v53 = vpack.c.bf16 %v2866_v49, %v2862_v48 }
 0x366   : > { %v2784_v56 = vpop.f32.mrb[36].mxu1  ;;  %3127 = vmatprep.subr.bf16.mxu1 %v2937_v54 }
 0x367   : > { %v2681_v55 = vpop.f32.mrb[40].mxu0  ;;  %3016 = vmatprep.subr.bf16.mxu0 %v2939_v53  ;;  %v2863_v58 = vmax.f32 %v2784_v56, 0.0  ;;  %v2786_v59 = vpop.f32.mrb[37].mxu1  ;;  %3128 = vmatpush1.bf16.msra.mxu1 %v2936_v52 }
 0x368   : > { %v2683_v57 = vpop.f32.mrb[41].mxu0  ;;  %3017 = vmatpush1.bf16.msra.mxu0 %v2938_v51  ;;  %v2788_v61 = vpop.f32.mrb[38].mxu1  ;;  %v2869_v62 = vmax.f32 %v2681_v55, 0.0  ;;  %v2864_v8 = vmax.f32 %v2786_v59, 0.0 }
 0x369   : > { %v2685_v22 = vpop.f32.mrb[42].mxu0  ;;  %v2867_v7 = vmax.f32 %v2788_v61, 0.0  ;;  %v2790_v10 = vpop.f32.mrb[39].mxu1  ;;  %v2870_v11 = vmax.f32 %v2683_v57, 0.0 }
 0x36a   : > { %v2873_v4 = vmax.f32 %v2685_v22, 0.0  ;;  %v2687_v6 = vpop.f32.mrb[43].mxu0  ;;  %v2868_v9 = vmax.f32 %v2790_v10, 0.0 }
 0x36b   : > { %v2874_v12 = vmax.f32 %v2687_v6, 0.0  ;;  %v2940_v13 = vpack.c.bf16 %v2867_v7, %v2863_v58 }
 0x36c   : > { %v2942_v60 = vpack.c.bf16 %v2873_v4, %v2869_v62  ;;  %v2941_v15 = vpack.c.bf16 %v2868_v9, %v2864_v8 }
 0x36d   : > { %v2943_v14 = vpack.c.bf16 %v2874_v12, %v2870_v11 }
 0x36e   : > { %v2794_v18 = vpop.f32.mrb[40].mxu1  ;;  %3129 = vmatprep.subr.bf16.mxu1 %v2941_v15 }
 0x36f   : > { %v2691_v16 = vpop.f32.mrb[44].mxu0  ;;  %3018 = vmatprep.subr.bf16.mxu0 %v2943_v14  ;;  %v2871_v20 = vmax.f32 %v2794_v18, 0.0  ;;  %v2796_v3 = vpop.f32.mrb[41].mxu1  ;;  %3130 = vmatpush1.bf16.msra.mxu1 %v2940_v13 }
 0x370   : > { %v2693_v1 = vpop.f32.mrb[45].mxu0  ;;  %3019 = vmatpush1.bf16.msra.mxu0 %v2942_v60  ;;  %v2798_v21 = vpop.f32.mrb[42].mxu1  ;;  %v2877_v25 = vmax.f32 %v2691_v16, 0.0  ;;  %v2872_v30 = vmax.f32 %v2796_v3, 0.0 }
 0x371   : > { %v2695_v19 = vpop.f32.mrb[46].mxu0  ;;  %v2875_v28 = vmax.f32 %v2798_v21, 0.0  ;;  %v2800_v24 = vpop.f32.mrb[43].mxu1  ;;  %v2878_v29 = vmax.f32 %v2693_v1, 0.0 }
 0x372   : > { %v2881_v26 = vmax.f32 %v2695_v19, 0.0  ;;  %v2697_v27 = vpop.f32.mrb[47].mxu0  ;;  %v2876_v31 = vmax.f32 %v2800_v24, 0.0 }
 0x373   : > { %v2882_v17 = vmax.f32 %v2697_v27, 0.0  ;;  %v2944_v33 = vpack.c.bf16 %v2875_v28, %v2871_v20 }
 0x374   : > { %v2946_v32 = vpack.c.bf16 %v2881_v26, %v2877_v25  ;;  %v2945_v35 = vpack.c.bf16 %v2876_v31, %v2872_v30 }
 0x375   : > { %v2947_v34 = vpack.c.bf16 %v2882_v17, %v2878_v29 }
 0x376   : > { %v2804_v63 = vpop.f32.mrb[44].mxu1  ;;  %3131 = vmatprep.subr.bf16.mxu1 %v2945_v35 }
 0x377   : > { %v2701_v36 = vpop.f32.mrb[48].mxu0  ;;  %3020 = vmatprep.subr.bf16.mxu0 %v2947_v34  ;;  %v2879_v38 = vmax.f32 %v2804_v63, 0.0  ;;  %v2806_v39 = vpop.f32.mrb[45].mxu1  ;;  %3132 = vmatpush1.bf16.msra.mxu1 %v2944_v33 }
 0x378   : > { %v2703_v37 = vpop.f32.mrb[49].mxu0  ;;  %3021 = vmatpush1.bf16.msra.mxu0 %v2946_v32  ;;  %v2808_v41 = vpop.f32.mrb[46].mxu1  ;;  %v2885_v2 = vmax.f32 %v2701_v36, 0.0  ;;  %v2880_v47 = vmax.f32 %v2806_v39, 0.0 }
 0x379   : > { %v2705_v40 = vpop.f32.mrb[50].mxu0  ;;  %v2883_v44 = vmax.f32 %v2808_v41, 0.0  ;;  %v2810_v45 = vpop.f32.mrb[47].mxu1  ;;  %v2886_v46 = vmax.f32 %v2703_v37, 0.0 }
 0x37a   : > { %v2889_v42 = vmax.f32 %v2705_v40, 0.0  ;;  %v2707_v43 = vpop.f32.mrb[51].mxu0  ;;  %v2884_v48 = vmax.f32 %v2810_v45, 0.0 }
 0x37b   : > { %v2890_v5 = vmax.f32 %v2707_v43, 0.0  ;;  %v2948_v23 = vpack.c.bf16 %v2883_v44, %v2879_v38 }
 0x37c   : > { %v2950_v49 = vpack.c.bf16 %v2889_v42, %v2885_v2  ;;  %v2949_v51 = vpack.c.bf16 %v2884_v48, %v2880_v47 }
 0x37d   : > { %v2951_v50 = vpack.c.bf16 %v2890_v5, %v2886_v46 }
 0x37e   : > { %v2814_v53 = vpop.f32.mrb[48].mxu1  ;;  %3133 = vmatprep.subr.bf16.mxu1 %v2949_v51 }
 0x37f   : > { %v2711_v52 = vpop.f32.mrb[52].mxu0  ;;  %3022 = vmatprep.subr.bf16.mxu0 %v2951_v50  ;;  %v2887_v55 = vmax.f32 %v2814_v53, 0.0  ;;  %v2816_v56 = vpop.f32.mrb[49].mxu1  ;;  %3134 = vmatpush1.bf16.msra.mxu1 %v2948_v23  ;;  %v4874_v23 = vld [vmem:[%s5590_s2 + $0x40] sm:$0xff]  }
 0x380   : > { %v2713_v54 = vpop.f32.mrb[53].mxu0  ;;  %3023 = vmatpush1.bf16.msra.mxu0 %v2950_v49  ;;  %v2818_v58 = vpop.f32.mrb[50].mxu1  ;;  %v2893_v59 = vmax.f32 %v2711_v52, 0.0  ;;  %v2888_v10 = vmax.f32 %v2816_v56, 0.0 }
 0x381   : > { %v2715_v57 = vpop.f32.mrb[54].mxu0  ;;  %v2891_v62 = vmax.f32 %v2818_v58, 0.0  ;;  %v2820_v4 = vpop.f32.mrb[51].mxu1  ;;  %v2894_v6 = vmax.f32 %v2713_v54, 0.0 }
 0x382   : > { %v2897_v22 = vmax.f32 %v2715_v57, 0.0  ;;  %v2717_v61 = vpop.f32.mrb[55].mxu0  ;;  %v2892_v11 = vmax.f32 %v2820_v4, 0.0  ;;  %v4878_v4 = vld [vmem:[%s5590_s2 + $0x60] sm:$0xff]  }
 0x383   : > { %v2898_v7 = vmax.f32 %v2717_v61, 0.0  ;;  %v2952_v8 = vpack.c.bf16 %v2891_v62, %v2887_v55  ;;  %v4876_v61 = vld [vmem:[%s5590_s2 + $0x50] sm:$0xff]   ;;  %v4877_v62 = vld [vmem:[%s5590_s2 + $0x58] sm:$0xff]  }
 0x384   : > { %v2954_v12 = vpack.c.bf16 %v2897_v22, %v2893_v59  ;;  %v2953_v60 = vpack.c.bf16 %v2892_v11, %v2888_v10  ;;  %v4875_v22 = vld [vmem:[%s5590_s2 + $0x48] sm:$0xff]   ;;  %v4881_v10 = vld [vmem:[%s5590_s2 + $0x78] sm:$0xff]  }
 0x385   : > { %v2955_v9 = vpack.c.bf16 %v2898_v7, %v2894_v6  ;;  %v4879_v6 = vld [vmem:[%s5590_s2 + $0x68] sm:$0xff]   ;;  %v4880_v7 = vld [vmem:[%s5590_s2 + $0x70] sm:$0xff]  }
 0x386   : > { %v2824_v14 = vpop.f32.mrb[52].mxu1  ;;  %3135 = vmatprep.subr.bf16.mxu1 %v2953_v60 }
 0x387   : > { %v2721_v13 = vpop.f32.mrb[56].mxu0  ;;  %3024 = vmatprep.subr.bf16.mxu0 %v2955_v9  ;;  %v2895_v16 = vmax.f32 %v2824_v14, 0.0  ;;  %v2826_v18 = vpop.f32.mrb[53].mxu1  ;;  %3136 = vmatpush1.bf16.msra.mxu1 %v2952_v8 }
 0x388   : > { %v2723_v15 = vpop.f32.mrb[57].mxu0  ;;  %3025 = vmatpush1.bf16.msra.mxu0 %v2954_v12  ;;  %v2828_v20 = vpop.f32.mrb[54].mxu1  ;;  %v2901_v3 = vmax.f32 %v2721_v13, 0.0  ;;  %v2896_v24 = vmax.f32 %v2826_v18, 0.0 }
 0x389   : > { %v2725_v1 = vpop.f32.mrb[58].mxu0  ;;  %v2899_v25 = vmax.f32 %v2828_v20, 0.0  ;;  %v2830_v26 = vpop.f32.mrb[55].mxu1  ;;  %v2902_v27 = vmax.f32 %v2723_v15, 0.0 }
 0x38a   : > { %v2905_v19 = vmax.f32 %v2725_v1, 0.0  ;;  %v2727_v21 = vpop.f32.mrb[59].mxu0  ;;  %v2900_v29 = vmax.f32 %v2830_v26, 0.0 }
 0x38b   : > { %v2906_v28 = vmax.f32 %v2727_v21, 0.0  ;;  %v2956_v30 = vpack.c.bf16 %v2899_v25, %v2895_v16 }
 0x38c   : > { %v2958_v17 = vpack.c.bf16 %v2905_v19, %v2901_v3  ;;  %v2957_v32 = vpack.c.bf16 %v2900_v29, %v2896_v24 }
 0x38d   : > { %v2959_v31 = vpack.c.bf16 %v2906_v28, %v2902_v27 }
 0x38e   : > { %v2834_v34 = vpop.f32.mrb[56].mxu1  ;;  %3137 = vmatprep.subr.bf16.mxu1 %v2957_v32 }
 0x38f   : > { %v2731_v33 = vpop.f32.mrb[60].mxu0  ;;  %3026 = vmatprep.subr.bf16.mxu0 %v2959_v31  ;;  %v2903_v36 = vmax.f32 %v2834_v34, 0.0  ;;  %v2836_v63 = vpop.f32.mrb[57].mxu1  ;;  %3138 = vmatpush1.bf16.msra.mxu1 %v2956_v30 }
 0x390   : > { %v2733_v35 = vpop.f32.mrb[61].mxu0  ;;  %3027 = vmatpush1.bf16.msra.mxu0 %v2958_v17  ;;  %v2838_v38 = vpop.f32.mrb[58].mxu1  ;;  %v2909_v39 = vmax.f32 %v2731_v33, 0.0  ;;  %v2904_v45 = vmax.f32 %v2836_v63, 0.0 }
 0x391   : > { %v2735_v37 = vpop.f32.mrb[62].mxu0  ;;  %v2907_v2 = vmax.f32 %v2838_v38, 0.0  ;;  %v2840_v42 = vpop.f32.mrb[59].mxu1  ;;  %v2910_v43 = vmax.f32 %v2733_v35, 0.0 }
 0x392   : > { %v2913_v40 = vmax.f32 %v2735_v37, 0.0  ;;  %v2737_v41 = vpop.f32.mrb[63].mxu0  ;;  %v2908_v46 = vmax.f32 %v2840_v42, 0.0 }
 0x393   : > { %v2914_v44 = vmax.f32 %v2737_v41, 0.0  ;;  %v2960_v47 = vpack.c.bf16 %v2907_v2, %v2903_v36 }
 0x394   : > { %v2962_v5 = vpack.c.bf16 %v2913_v40, %v2909_v39  ;;  %v2961_v49 = vpack.c.bf16 %v2908_v46, %v2904_v45 }
 0x395   : > { %v2963_v48 = vpack.c.bf16 %v2914_v44, %v2910_v43 }
 0x396   : > { %v2844_v50 = vpop.f32.mrb[60].mxu1  ;;  %3139 = vmatprep.subr.bf16.mxu1 %v2961_v49 }
 0x397   : > { %3028 = vmatprep.subr.bf16.mxu0 %v2963_v48  ;;  %v2911_v51 = vmax.f32 %v2844_v50, 0.0  ;;  %v2846_v52 = vpop.f32.mrb[61].mxu1  ;;  %3140 = vmatpush1.bf16.msra.mxu1 %v2960_v47 }
 0x398   : > { %3029 = vmatpush1.bf16.msra.mxu0 %v2962_v5  ;;  %v2848_v53 = vpop.f32.mrb[62].mxu1  ;;  %v2912_v56 = vmax.f32 %v2846_v52, 0.0 }
 0x399   : > { %v2915_v54 = vmax.f32 %v2848_v53, 0.0  ;;  %v2850_v55 = vpop.f32.mrb[63].mxu1 }
 0x39a   : > { %v2916_v57 = vmax.f32 %v2850_v55, 0.0 }
 0x39b   : > { %3047 = vmatmul.mubr.bf16.vlgmr.msra.gmra.mrb[64].mxu0 %v4874_v23  ;;  %v2964_v58 = vpack.c.bf16 %v2915_v54, %v2911_v51 }
 0x39c   : > { %3056 = vmatprep.mubr.bf16.mxu0 %v4914_v0  ;;  %v2965_v59 = vpack.c.bf16 %v2916_v57, %v2912_v56 }
 0x39e   : > { %3141 = vmatprep.subr.bf16.mxu1 %v2965_v59 }
 0x39f   : > { %3142 = vmatpush1.bf16.msra.mxu1 %v2964_v58 }
 0x3a2   : > { %3160 = vmatmul.mubr.bf16.vlgmr.msra.gmra.mrb[64].mxu1 %v4874_v23 }
 0x3a3   : > { %3057 = vmatmul.mubr.bf16.gmra.mrb[68].mxu0 %v4875_v22  ;;  %3169 = vmatprep.mubr.bf16.mxu1 %v4914_v0 }
 0x3a4   : > { %3066 = vmatprep.mubr.bf16.mxu0 %v4914_v0 }
 0x3aa   : > { %3170 = vmatmul.mubr.bf16.gmra.mrb[68].mxu1 %v4875_v22 }
 0x3ab   : > { %3067 = vmatmul.mubr.bf16.gmra.mrb[72].mxu0 %v4876_v61  ;;  %3179 = vmatprep.mubr.bf16.mxu1 %v4914_v0 }
 0x3ac   : > { %3076 = vmatprep.mubr.bf16.mxu0 %v4914_v0 }
 0x3b2   : > { %3180 = vmatmul.mubr.bf16.gmra.mrb[72].mxu1 %v4876_v61 }
 0x3b3   : > { %3077 = vmatmul.mubr.bf16.gmra.mrb[76].mxu0 %v4877_v62  ;;  %3189 = vmatprep.mubr.bf16.mxu1 %v4914_v0 }
 0x3b4   : > { %3086 = vmatprep.mubr.bf16.mxu0 %v4914_v0 }
 0x3ba   : > { %3190 = vmatmul.mubr.bf16.gmra.mrb[76].mxu1 %v4877_v62 }
 0x3bb   : > { %3087 = vmatmul.mubr.bf16.gmra.mrb[80].mxu0 %v4878_v4  ;;  %3199 = vmatprep.mubr.bf16.mxu1 %v4914_v0 }
 0x3bc   : > { %3096 = vmatprep.mubr.bf16.mxu0 %v4914_v0 }
 0x3c2   : > { %3200 = vmatmul.mubr.bf16.gmra.mrb[80].mxu1 %v4878_v4 }
 0x3c3   : > { %3097 = vmatmul.mubr.bf16.gmra.mrb[84].mxu0 %v4879_v6  ;;  %3209 = vmatprep.mubr.bf16.mxu1 %v4914_v0 }
 0x3c4   : > { %3106 = vmatprep.mubr.bf16.mxu0 %v4914_v0 }
 0x3ca   : > { %3210 = vmatmul.mubr.bf16.gmra.mrb[84].mxu1 %v4879_v6 }
 0x3cb   : > { %3107 = vmatmul.mubr.bf16.gmra.mrb[88].mxu0 %v4880_v7  ;;  %3219 = vmatprep.mubr.bf16.mxu1 %v4914_v0 }
 0x3cc   : > { %3116 = vmatprep.mubr.bf16.mxu0 %v4914_v0 }
 0x3d2   : > { %3220 = vmatmul.mubr.bf16.gmra.mrb[88].mxu1 %v4880_v7 }
 0x3d3   : > { %3117 = vmatmul.mubr.bf16.gmra.mrb[92].mxu0 %v4881_v10  ;;  %3229 = vmatprep.mubr.bf16.mxu1 %v4914_v0 }
 0x3d4   : > { %3433 = vmatprep.mubr.bf16.mxu0 %v4914_v0 }
 0x3da   : > { %3230 = vmatmul.mubr.bf16.gmra.mrb[92].mxu1 %v4881_v10 }
 0x3db   : > { %3546 = vmatprep.mubr.bf16.mxu1 %v4914_v0 }
 0x46e   : > { %v3048_v11 = vpop.f32.mrb[64].mxu0 }
 0x46f   : > { %v3050_v12 = vpop.f32.mrb[65].mxu0  ;;  %v3240_v9 = vmax.f32 %v3048_v11, 0.0 }
 0x470   : > { %v3052_v8 = vpop.f32.mrb[66].mxu0  ;;  %v3241_v14 = vmax.f32 %v3050_v12, 0.0 }
 0x471   : > { %v3244_v60 = vmax.f32 %v3052_v8, 0.0  ;;  %v3054_v13 = vpop.f32.mrb[67].mxu0 }
 0x472   : > { %v3245_v15 = vmax.f32 %v3054_v13, 0.0 }
 0x473   : > { %v3321_v16 = vpack.c.bf16 %v3244_v60, %v3240_v9 }
 0x474   : > { %v3322_v18 = vpack.c.bf16 %v3245_v15, %v3241_v14 }
 0x475   : > { %v3161_v20 = vpop.f32.mrb[64].mxu1 }
 0x476   : > { %v3058_v1 = vpop.f32.mrb[68].mxu0  ;;  %3401 = vmatprep.subr.bf16.mxu0 %v3322_v18  ;;  %v3242_v19 = vmax.f32 %v3161_v20, 0.0  ;;  %v3163_v21 = vpop.f32.mrb[65].mxu1 }
 0x477   : > { %v3060_v3 = vpop.f32.mrb[69].mxu0  ;;  %3402 = vmatpush1.bf16.msra.mxu0 %v3321_v16  ;;  %v3165_v26 = vpop.f32.mrb[66].mxu1  ;;  %v3248_v27 = vmax.f32 %v3058_v1, 0.0  ;;  %v3243_v32 = vmax.f32 %v3163_v21, 0.0 }
 0x478   : > { %v3062_v25 = vpop.f32.mrb[70].mxu0  ;;  %v3246_v29 = vmax.f32 %v3165_v26, 0.0  ;;  %v3167_v17 = vpop.f32.mrb[67].mxu1  ;;  %v3249_v30 = vmax.f32 %v3060_v3, 0.0 }
 0x479   : > { %v3252_v28 = vmax.f32 %v3062_v25, 0.0  ;;  %v3064_v24 = vpop.f32.mrb[71].mxu0  ;;  %v3247_v33 = vmax.f32 %v3167_v17, 0.0 }
 0x47a   : > { %v3253_v31 = vmax.f32 %v3064_v24, 0.0  ;;  %v3323_v35 = vpack.c.bf16 %v3246_v29, %v3242_v19 }
 0x47b   : > { %v3325_v34 = vpack.c.bf16 %v3252_v28, %v3248_v27  ;;  %v3324_v63 = vpack.c.bf16 %v3247_v33, %v3243_v32 }
 0x47c   : > { %v3326_v36 = vpack.c.bf16 %v3253_v31, %v3249_v30 }
 0x47d   : > { %v3171_v38 = vpop.f32.mrb[68].mxu1  ;;  %3514 = vmatprep.subr.bf16.mxu1 %v3324_v63 }
 0x47e   : > { %v3068_v37 = vpop.f32.mrb[72].mxu0  ;;  %3403 = vmatprep.subr.bf16.mxu0 %v3326_v36  ;;  %v3250_v40 = vmax.f32 %v3171_v38, 0.0  ;;  %v3173_v41 = vpop.f32.mrb[69].mxu1  ;;  %3515 = vmatpush1.bf16.msra.mxu1 %v3323_v35 }
 0x47f   : > { %v3070_v39 = vpop.f32.mrb[73].mxu0  ;;  %3404 = vmatpush1.bf16.msra.mxu0 %v3325_v34  ;;  %v3175_v42 = vpop.f32.mrb[70].mxu1  ;;  %v3256_v43 = vmax.f32 %v3068_v37, 0.0  ;;  %v3251_v49 = vmax.f32 %v3173_v41, 0.0 }
 0x480   : > { %v3072_v2 = vpop.f32.mrb[74].mxu0  ;;  %v3254_v46 = vmax.f32 %v3175_v42, 0.0  ;;  %v3177_v5 = vpop.f32.mrb[71].mxu1  ;;  %v3257_v47 = vmax.f32 %v3070_v39, 0.0 }
 0x481   : > { %v3260_v44 = vmax.f32 %v3072_v2, 0.0  ;;  %v3074_v45 = vpop.f32.mrb[75].mxu0  ;;  %v3255_v23 = vmax.f32 %v3177_v5, 0.0 }
 0x482   : > { %v3261_v48 = vmax.f32 %v3074_v45, 0.0  ;;  %v3327_v51 = vpack.c.bf16 %v3254_v46, %v3250_v40 }
 0x483   : > { %v3329_v50 = vpack.c.bf16 %v3260_v44, %v3256_v43  ;;  %v3328_v53 = vpack.c.bf16 %v3255_v23, %v3251_v49 }
 0x484   : > { %v3330_v52 = vpack.c.bf16 %v3261_v48, %v3257_v47 }
 0x485   : > { %v3181_v55 = vpop.f32.mrb[72].mxu1  ;;  %3516 = vmatprep.subr.bf16.mxu1 %v3328_v53 }
 0x486   : > { %v3078_v54 = vpop.f32.mrb[76].mxu0  ;;  %3405 = vmatprep.subr.bf16.mxu0 %v3330_v52  ;;  %v3258_v57 = vmax.f32 %v3181_v55, 0.0  ;;  %v3183_v58 = vpop.f32.mrb[73].mxu1  ;;  %3517 = vmatpush1.bf16.msra.mxu1 %v3327_v51 }
 0x487   : > { %v3080_v56 = vpop.f32.mrb[77].mxu0  ;;  %3406 = vmatpush1.bf16.msra.mxu0 %v3329_v50  ;;  %v3185_v22 = vpop.f32.mrb[74].mxu1  ;;  %v3264_v61 = vmax.f32 %v3078_v54, 0.0  ;;  %v3259_v12 = vmax.f32 %v3183_v58, 0.0 }
 0x488   : > { %v3082_v59 = vpop.f32.mrb[78].mxu0  ;;  %v3262_v6 = vmax.f32 %v3185_v22, 0.0  ;;  %v3187_v7 = vpop.f32.mrb[75].mxu1  ;;  %v3265_v10 = vmax.f32 %v3080_v56, 0.0 }
 0x489   : > { %v3268_v62 = vmax.f32 %v3082_v59, 0.0  ;;  %v3084_v4 = vpop.f32.mrb[79].mxu0  ;;  %v3263_v8 = vmax.f32 %v3187_v7, 0.0 }
 0x48a   : > { %v3269_v11 = vmax.f32 %v3084_v4, 0.0  ;;  %v3331_v60 = vpack.c.bf16 %v3262_v6, %v3258_v57 }
 0x48b   : > { %v3333_v9 = vpack.c.bf16 %v3268_v62, %v3264_v61  ;;  %v3332_v14 = vpack.c.bf16 %v3263_v8, %v3259_v12 }
 0x48c   : > { %v3334_v13 = vpack.c.bf16 %v3269_v11, %v3265_v10 }
 0x48d   : > { %v3191_v16 = vpop.f32.mrb[76].mxu1  ;;  %3518 = vmatprep.subr.bf16.mxu1 %v3332_v14 }
 0x48e   : > { %v3088_v15 = vpop.f32.mrb[80].mxu0  ;;  %3407 = vmatprep.subr.bf16.mxu0 %v3334_v13  ;;  %v3266_v1 = vmax.f32 %v3191_v16, 0.0  ;;  %v3193_v20 = vpop.f32.mrb[77].mxu1  ;;  %3519 = vmatpush1.bf16.msra.mxu1 %v3331_v60 }
 0x48f   : > { %v3090_v18 = vpop.f32.mrb[81].mxu0  ;;  %3408 = vmatpush1.bf16.msra.mxu0 %v3333_v9  ;;  %v3195_v19 = vpop.f32.mrb[78].mxu1  ;;  %v3272_v21 = vmax.f32 %v3088_v15, 0.0  ;;  %v3267_v17 = vmax.f32 %v3193_v20, 0.0 }
 0x490   : > { %v3092_v3 = vpop.f32.mrb[82].mxu0  ;;  %v3270_v27 = vmax.f32 %v3195_v19, 0.0  ;;  %v3197_v28 = vpop.f32.mrb[79].mxu1  ;;  %v3273_v24 = vmax.f32 %v3090_v18, 0.0 }
 0x491   : > { %v3276_v25 = vmax.f32 %v3092_v3, 0.0  ;;  %v3094_v26 = vpop.f32.mrb[83].mxu0  ;;  %v3271_v30 = vmax.f32 %v3197_v28, 0.0 }
 0x492   : > { %v3277_v29 = vmax.f32 %v3094_v26, 0.0  ;;  %v3335_v32 = vpack.c.bf16 %v3270_v27, %v3266_v1 }
 0x493   : > { %v3337_v31 = vpack.c.bf16 %v3276_v25, %v3272_v21  ;;  %v3336_v34 = vpack.c.bf16 %v3271_v30, %v3267_v17 }
 0x494   : > { %v3338_v33 = vpack.c.bf16 %v3277_v29, %v3273_v24 }
 0x495   : > { %v3201_v36 = vpop.f32.mrb[80].mxu1  ;;  %3520 = vmatprep.subr.bf16.mxu1 %v3336_v34 }
 0x496   : > { %v3098_v35 = vpop.f32.mrb[84].mxu0  ;;  %3409 = vmatprep.subr.bf16.mxu0 %v3338_v33  ;;  %v3274_v37 = vmax.f32 %v3201_v36, 0.0  ;;  %v3203_v38 = vpop.f32.mrb[81].mxu1  ;;  %3521 = vmatpush1.bf16.msra.mxu1 %v3335_v32  ;;  %v4882_v32 = vld [vmem:[%s5590_s2 + $0x80] sm:$0xff]  }
 0x497   : > { %v3100_v63 = vpop.f32.mrb[85].mxu0  ;;  %3410 = vmatpush1.bf16.msra.mxu0 %v3337_v31  ;;  %v3205_v40 = vpop.f32.mrb[82].mxu1  ;;  %v3280_v41 = vmax.f32 %v3098_v35, 0.0  ;;  %v3275_v5 = vmax.f32 %v3203_v38, 0.0 }
 0x498   : > { %v3102_v39 = vpop.f32.mrb[86].mxu0  ;;  %v3278_v43 = vmax.f32 %v3205_v40, 0.0  ;;  %v3207_v44 = vpop.f32.mrb[83].mxu1  ;;  %v3281_v45 = vmax.f32 %v3100_v63, 0.0 }
 0x499   : > { %v3284_v2 = vmax.f32 %v3102_v39, 0.0  ;;  %v3104_v42 = vpop.f32.mrb[87].mxu0  ;;  %v3279_v47 = vmax.f32 %v3207_v44, 0.0  ;;  %v4886_v44 = vld [vmem:[%s5590_s2 + $0xa0] sm:$0xff]  }
 0x49a   : > { %v3285_v46 = vmax.f32 %v3104_v42, 0.0  ;;  %v3339_v49 = vpack.c.bf16 %v3278_v43, %v3274_v37  ;;  %v4884_v42 = vld [vmem:[%s5590_s2 + $0x90] sm:$0xff]   ;;  %v4885_v43 = vld [vmem:[%s5590_s2 + $0x98] sm:$0xff]  }
 0x49b   : > { %v3341_v48 = vpack.c.bf16 %v3284_v2, %v3280_v41  ;;  %v3340_v50 = vpack.c.bf16 %v3279_v47, %v3275_v5  ;;  %v4883_v2 = vld [vmem:[%s5590_s2 + $0x88] sm:$0xff]   ;;  %v4889_v5 = vld [vmem:[%s5590_s2 + $0xb8] sm:$0xff]  }
 0x49c   : > { %v3342_v23 = vpack.c.bf16 %v3285_v46, %v3281_v45  ;;  %v4887_v45 = vld [vmem:[%s5590_s2 + $0xa8] sm:$0xff]   ;;  %v4888_v46 = vld [vmem:[%s5590_s2 + $0xb0] sm:$0xff]  }
 0x49d   : > { %v3211_v52 = vpop.f32.mrb[84].mxu1  ;;  %3522 = vmatprep.subr.bf16.mxu1 %v3340_v50 }
 0x49e   : > { %v3108_v51 = vpop.f32.mrb[88].mxu0  ;;  %3411 = vmatprep.subr.bf16.mxu0 %v3342_v23  ;;  %v3282_v54 = vmax.f32 %v3211_v52, 0.0  ;;  %v3213_v55 = vpop.f32.mrb[85].mxu1  ;;  %3523 = vmatpush1.bf16.msra.mxu1 %v3339_v49 }
 0x49f   : > { %v3110_v53 = vpop.f32.mrb[89].mxu0  ;;  %3412 = vmatpush1.bf16.msra.mxu0 %v3341_v48  ;;  %v3215_v57 = vpop.f32.mrb[86].mxu1  ;;  %v3288_v58 = vmax.f32 %v3108_v51, 0.0  ;;  %v3283_v7 = vmax.f32 %v3213_v55, 0.0 }
 0x4a0   : > { %v3112_v56 = vpop.f32.mrb[90].mxu0  ;;  %v3286_v61 = vmax.f32 %v3215_v57, 0.0  ;;  %v3217_v62 = vpop.f32.mrb[87].mxu1  ;;  %v3289_v4 = vmax.f32 %v3110_v53, 0.0 }
 0x4a1   : > { %v3292_v59 = vmax.f32 %v3112_v56, 0.0  ;;  %v3114_v22 = vpop.f32.mrb[91].mxu0  ;;  %v3287_v10 = vmax.f32 %v3217_v62, 0.0 }
 0x4a2   : > { %v3293_v6 = vmax.f32 %v3114_v22, 0.0  ;;  %v3343_v12 = vpack.c.bf16 %v3286_v61, %v3282_v54 }
 0x4a3   : > { %v3345_v11 = vpack.c.bf16 %v3292_v59, %v3288_v58  ;;  %v3344_v9 = vpack.c.bf16 %v3287_v10, %v3283_v7 }
 0x4a4   : > { %v3346_v8 = vpack.c.bf16 %v3293_v6, %v3289_v4 }
 0x4a5   : > { %v3221_v13 = vpop.f32.mrb[88].mxu1  ;;  %3524 = vmatprep.subr.bf16.mxu1 %v3344_v9 }
 0x4a6   : > { %v3118_v60 = vpop.f32.mrb[92].mxu0  ;;  %3413 = vmatprep.subr.bf16.mxu0 %v3346_v8  ;;  %v3290_v15 = vmax.f32 %v3221_v13, 0.0  ;;  %v3223_v16 = vpop.f32.mrb[89].mxu1  ;;  %3525 = vmatpush1.bf16.msra.mxu1 %v3343_v12 }
 0x4a7   : > { %v3120_v14 = vpop.f32.mrb[93].mxu0  ;;  %3414 = vmatpush1.bf16.msra.mxu0 %v3345_v11  ;;  %v3225_v1 = vpop.f32.mrb[90].mxu1  ;;  %v3296_v20 = vmax.f32 %v3118_v60, 0.0  ;;  %v3291_v28 = vmax.f32 %v3223_v16, 0.0 }
 0x4a8   : > { %v3122_v18 = vpop.f32.mrb[94].mxu0  ;;  %v3294_v21 = vmax.f32 %v3225_v1, 0.0  ;;  %v3227_v25 = vpop.f32.mrb[91].mxu1  ;;  %v3297_v26 = vmax.f32 %v3120_v14, 0.0 }
 0x4a9   : > { %v3300_v3 = vmax.f32 %v3122_v18, 0.0  ;;  %v3124_v19 = vpop.f32.mrb[95].mxu0  ;;  %v3295_v24 = vmax.f32 %v3227_v25, 0.0 }
 0x4aa   : > { %v3301_v27 = vmax.f32 %v3124_v19, 0.0  ;;  %v3347_v17 = vpack.c.bf16 %v3294_v21, %v3290_v15 }
 0x4ab   : > { %v3349_v29 = vpack.c.bf16 %v3300_v3, %v3296_v20  ;;  %v3348_v31 = vpack.c.bf16 %v3295_v24, %v3291_v28 }
 0x4ac   : > { %v3350_v30 = vpack.c.bf16 %v3301_v27, %v3297_v26 }
 0x4ad   : > { %v3231_v33 = vpop.f32.mrb[92].mxu1  ;;  %3526 = vmatprep.subr.bf16.mxu1 %v3348_v31 }
 0x4ae   : > { %3415 = vmatprep.subr.bf16.mxu0 %v3350_v30  ;;  %v3298_v34 = vmax.f32 %v3231_v33, 0.0  ;;  %v3233_v35 = vpop.f32.mrb[93].mxu1  ;;  %3527 = vmatpush1.bf16.msra.mxu1 %v3347_v17 }
 0x4af   : > { %3416 = vmatpush1.bf16.msra.mxu0 %v3349_v29  ;;  %v3235_v36 = vpop.f32.mrb[94].mxu1  ;;  %v3299_v38 = vmax.f32 %v3233_v35, 0.0 }
 0x4b0   : > { %v3302_v63 = vmax.f32 %v3235_v36, 0.0  ;;  %v3237_v37 = vpop.f32.mrb[95].mxu1 }
 0x4b1   : > { %v3303_v39 = vmax.f32 %v3237_v37, 0.0 }
 0x4b2   : > { %3434 = vmatmul.mubr.bf16.vlgmr.msra.gmra.mrb[96].mxu0 %v4882_v32  ;;  %v3351_v40 = vpack.c.bf16 %v3302_v63, %v3298_v34 }
 0x4b3   : > { %3443 = vmatprep.mubr.bf16.mxu0 %v4914_v0  ;;  %v3352_v41 = vpack.c.bf16 %v3303_v39, %v3299_v38 }
 0x4b5   : > { %3528 = vmatprep.subr.bf16.mxu1 %v3352_v41 }
 0x4b6   : > { %3529 = vmatpush1.bf16.msra.mxu1 %v3351_v40 }
 0x4b9   : > { %3547 = vmatmul.mubr.bf16.vlgmr.msra.gmra.mrb[96].mxu1 %v4882_v32 }
 0x4ba   : > { %3444 = vmatmul.mubr.bf16.gmra.mrb[100].mxu0 %v4883_v2  ;;  %3556 = vmatprep.mubr.bf16.mxu1 %v4914_v0 }
 0x4bb   : > { %3453 = vmatprep.mubr.bf16.mxu0 %v4914_v0 }
 0x4c1   : > { %3557 = vmatmul.mubr.bf16.gmra.mrb[100].mxu1 %v4883_v2 }
 0x4c2   : > { %3454 = vmatmul.mubr.bf16.gmra.mrb[104].mxu0 %v4884_v42  ;;  %3566 = vmatprep.mubr.bf16.mxu1 %v4914_v0 }
 0x4c3   : > { %3463 = vmatprep.mubr.bf16.mxu0 %v4914_v0 }
 0x4c9   : > { %3567 = vmatmul.mubr.bf16.gmra.mrb[104].mxu1 %v4884_v42 }
 0x4ca   : > { %3464 = vmatmul.mubr.bf16.gmra.mrb[108].mxu0 %v4885_v43  ;;  %3576 = vmatprep.mubr.bf16.mxu1 %v4914_v0 }
 0x4cb   : > { %3473 = vmatprep.mubr.bf16.mxu0 %v4914_v0 }
 0x4d1   : > { %3577 = vmatmul.mubr.bf16.gmra.mrb[108].mxu1 %v4885_v43 }
 0x4d2   : > { %3474 = vmatmul.mubr.bf16.gmra.mrb[112].mxu0 %v4886_v44  ;;  %3586 = vmatprep.mubr.bf16.mxu1 %v4914_v0 }
 0x4d3   : > { %3483 = vmatprep.mubr.bf16.mxu0 %v4914_v0 }
 0x4d9   : > { %3587 = vmatmul.mubr.bf16.gmra.mrb[112].mxu1 %v4886_v44 }
 0x4da   : > { %3484 = vmatmul.mubr.bf16.gmra.mrb[116].mxu0 %v4887_v45  ;;  %3596 = vmatprep.mubr.bf16.mxu1 %v4914_v0 }
 0x4db   : > { %3493 = vmatprep.mubr.bf16.mxu0 %v4914_v0 }
 0x4e1   : > { %3597 = vmatmul.mubr.bf16.gmra.mrb[116].mxu1 %v4887_v45 }
 0x4e2   : > { %3494 = vmatmul.mubr.bf16.gmra.mrb[120].mxu0 %v4888_v46  ;;  %3606 = vmatprep.mubr.bf16.mxu1 %v4914_v0 }
 0x4e3   : > { %3503 = vmatprep.mubr.bf16.mxu0 %v4914_v0 }
 0x4e9   : > { %3607 = vmatmul.mubr.bf16.gmra.mrb[120].mxu1 %v4888_v46 }
 0x4ea   : > { %3504 = vmatmul.mubr.bf16.gmra.mrb[124].mxu0 %v4889_v5  ;;  %3616 = vmatprep.mubr.bf16.mxu1 %v4914_v0 }
 0x4eb   : > { %3820 = vmatprep.mubr.bf16.mxu0 %v4914_v0 }
 0x4f1   : > { %3617 = vmatmul.mubr.bf16.gmra.mrb[124].mxu1 %v4889_v5 }
 0x4f2   : > { %3933 = vmatprep.mubr.bf16.mxu1 %v4914_v0 }
 0x585   : > { %v3435_v47 = vpop.f32.mrb[96].mxu0 }
 0x586   : > { %v3437_v48 = vpop.f32.mrb[97].mxu0  ;;  %v3627_v23 = vmax.f32 %v3435_v47, 0.0 }
 0x587   : > { %v3439_v49 = vpop.f32.mrb[98].mxu0  ;;  %v3628_v52 = vmax.f32 %v3437_v48, 0.0 }
 0x588   : > { %v3631_v50 = vmax.f32 %v3439_v49, 0.0  ;;  %v3441_v51 = vpop.f32.mrb[99].mxu0 }
 0x589   : > { %v3632_v53 = vmax.f32 %v3441_v51, 0.0 }
 0x58a   : > { %v3708_v54 = vpack.c.bf16 %v3631_v50, %v3627_v23 }
 0x58b   : > { %v3709_v55 = vpack.c.bf16 %v3632_v53, %v3628_v52 }
 0x58c   : > { %v3548_v57 = vpop.f32.mrb[96].mxu1 }
 0x58d   : > { %v3445_v56 = vpop.f32.mrb[100].mxu0  ;;  %3788 = vmatprep.subr.bf16.mxu0 %v3709_v55  ;;  %v3629_v59 = vmax.f32 %v3548_v57, 0.0  ;;  %v3550_v22 = vpop.f32.mrb[97].mxu1 }
 0x58e   : > { %v3447_v58 = vpop.f32.mrb[101].mxu0  ;;  %3789 = vmatpush1.bf16.msra.mxu0 %v3708_v54  ;;  %v3552_v62 = vpop.f32.mrb[98].mxu1  ;;  %v3635_v4 = vmax.f32 %v3445_v56, 0.0  ;;  %v3630_v9 = vmax.f32 %v3550_v22, 0.0 }
 0x58f   : > { %v3449_v61 = vpop.f32.mrb[102].mxu0  ;;  %v3633_v10 = vmax.f32 %v3552_v62, 0.0  ;;  %v3554_v11 = vpop.f32.mrb[99].mxu1  ;;  %v3636_v12 = vmax.f32 %v3447_v58, 0.0 }
 0x590   : > { %v3639_v6 = vmax.f32 %v3449_v61, 0.0  ;;  %v3451_v7 = vpop.f32.mrb[103].mxu0  ;;  %v3634_v60 = vmax.f32 %v3554_v11, 0.0 }
 0x591   : > { %v3640_v8 = vmax.f32 %v3451_v7, 0.0  ;;  %v3710_v14 = vpack.c.bf16 %v3633_v10, %v3629_v59 }
 0x592   : > { %v3712_v13 = vpack.c.bf16 %v3639_v6, %v3635_v4  ;;  %v3711_v16 = vpack.c.bf16 %v3634_v60, %v3630_v9 }
 0x593   : > { %v3713_v15 = vpack.c.bf16 %v3640_v8, %v3636_v12 }
 0x594   : > { %v3558_v1 = vpop.f32.mrb[100].mxu1  ;;  %3901 = vmatprep.subr.bf16.mxu1 %v3711_v16 }
 0x595   : > { %v3455_v18 = vpop.f32.mrb[104].mxu0  ;;  %3790 = vmatprep.subr.bf16.mxu0 %v3713_v15  ;;  %v3637_v3 = vmax.f32 %v3558_v1, 0.0  ;;  %v3560_v19 = vpop.f32.mrb[101].mxu1  ;;  %3902 = vmatpush1.bf16.msra.mxu1 %v3710_v14 }
 0x596   : > { %v3457_v20 = vpop.f32.mrb[105].mxu0  ;;  %3791 = vmatpush1.bf16.msra.mxu0 %v3712_v13  ;;  %v3562_v25 = vpop.f32.mrb[102].mxu1  ;;  %v3643_v26 = vmax.f32 %v3455_v18, 0.0  ;;  %v3638_v31 = vmax.f32 %v3560_v19, 0.0 }
 0x597   : > { %v3459_v21 = vpop.f32.mrb[106].mxu0  ;;  %v3641_v24 = vmax.f32 %v3562_v25, 0.0  ;;  %v3564_v29 = vpop.f32.mrb[103].mxu1  ;;  %v3644_v17 = vmax.f32 %v3457_v20, 0.0 }
 0x598   : > { %v3647_v27 = vmax.f32 %v3459_v21, 0.0  ;;  %v3461_v28 = vpop.f32.mrb[107].mxu0  ;;  %v3642_v32 = vmax.f32 %v3564_v29, 0.0 }
 0x599   : > { %v3648_v30 = vmax.f32 %v3461_v28, 0.0  ;;  %v3714_v34 = vpack.c.bf16 %v3641_v24, %v3637_v3 }
 0x59a   : > { %v3716_v33 = vpack.c.bf16 %v3647_v27, %v3643_v26  ;;  %v3715_v36 = vpack.c.bf16 %v3642_v32, %v3638_v31 }
 0x59b   : > { %v3717_v35 = vpack.c.bf16 %v3648_v30, %v3644_v17 }
 0x59c   : > { %v3568_v37 = vpop.f32.mrb[104].mxu1  ;;  %3903 = vmatprep.subr.bf16.mxu1 %v3715_v36 }
 0x59d   : > { %v3465_v63 = vpop.f32.mrb[108].mxu0  ;;  %3792 = vmatprep.subr.bf16.mxu0 %v3717_v35  ;;  %v3645_v39 = vmax.f32 %v3568_v37, 0.0  ;;  %v3570_v40 = vpop.f32.mrb[105].mxu1  ;;  %3904 = vmatpush1.bf16.msra.mxu1 %v3714_v34 }
 0x59e   : > { %v3467_v38 = vpop.f32.mrb[109].mxu0  ;;  %3793 = vmatpush1.bf16.msra.mxu0 %v3716_v33  ;;  %v3572_v2 = vpop.f32.mrb[106].mxu1  ;;  %v3651_v42 = vmax.f32 %v3465_v63, 0.0  ;;  %v3646_v48 = vmax.f32 %v3570_v40, 0.0 }
 0x59f   : > { %v3469_v41 = vpop.f32.mrb[110].mxu0  ;;  %v3649_v45 = vmax.f32 %v3572_v2, 0.0  ;;  %v3574_v46 = vpop.f32.mrb[107].mxu1  ;;  %v3652_v5 = vmax.f32 %v3467_v38, 0.0 }
 0x5a0   : > { %v3655_v43 = vmax.f32 %v3469_v41, 0.0  ;;  %v3471_v44 = vpop.f32.mrb[111].mxu0  ;;  %v3650_v49 = vmax.f32 %v3574_v46, 0.0 }
 0x5a1   : > { %v3656_v47 = vmax.f32 %v3471_v44, 0.0  ;;  %v3718_v50 = vpack.c.bf16 %v3649_v45, %v3645_v39 }
 0x5a2   : > { %v3720_v23 = vpack.c.bf16 %v3655_v43, %v3651_v42  ;;  %v3719_v52 = vpack.c.bf16 %v3650_v49, %v3646_v48 }
 0x5a3   : > { %v3721_v51 = vpack.c.bf16 %v3656_v47, %v3652_v5 }
 0x5a4   : > { %v3578_v54 = vpop.f32.mrb[108].mxu1  ;;  %3905 = vmatprep.subr.bf16.mxu1 %v3719_v52 }
 0x5a5   : > { %v3475_v53 = vpop.f32.mrb[112].mxu0  ;;  %3794 = vmatprep.subr.bf16.mxu0 %v3721_v51  ;;  %v3653_v56 = vmax.f32 %v3578_v54, 0.0  ;;  %v3580_v57 = vpop.f32.mrb[109].mxu1  ;;  %3906 = vmatpush1.bf16.msra.mxu1 %v3718_v50 }
 0x5a6   : > { %v3477_v55 = vpop.f32.mrb[113].mxu0  ;;  %3795 = vmatpush1.bf16.msra.mxu0 %v3720_v23  ;;  %v3582_v59 = vpop.f32.mrb[110].mxu1  ;;  %v3659_v22 = vmax.f32 %v3475_v53, 0.0  ;;  %v3654_v11 = vmax.f32 %v3580_v57, 0.0 }
 0x5a7   : > { %v3479_v58 = vpop.f32.mrb[114].mxu0  ;;  %v3657_v4 = vmax.f32 %v3582_v59, 0.0  ;;  %v3584_v6 = vpop.f32.mrb[111].mxu1  ;;  %v3660_v7 = vmax.f32 %v3477_v55, 0.0 }
 0x5a8   : > { %v3663_v61 = vmax.f32 %v3479_v58, 0.0  ;;  %v3481_v62 = vpop.f32.mrb[115].mxu0  ;;  %v3658_v12 = vmax.f32 %v3584_v6, 0.0 }
 0x5a9   : > { %v3664_v10 = vmax.f32 %v3481_v62, 0.0  ;;  %v3722_v9 = vpack.c.bf16 %v3657_v4, %v3653_v56 }
 0x5aa   : > { %v3724_v8 = vpack.c.bf16 %v3663_v61, %v3659_v22  ;;  %v3723_v13 = vpack.c.bf16 %v3658_v12, %v3654_v11 }
 0x5ab   : > { %v3725_v60 = vpack.c.bf16 %v3664_v10, %v3660_v7 }
 0x5ac   : > { %v3588_v15 = vpop.f32.mrb[112].mxu1  ;;  %3907 = vmatprep.subr.bf16.mxu1 %v3723_v13 }
 0x5ad   : > { %v3485_v14 = vpop.f32.mrb[116].mxu0  ;;  %3796 = vmatprep.subr.bf16.mxu0 %v3725_v60  ;;  %v3661_v18 = vmax.f32 %v3588_v15, 0.0  ;;  %v3590_v1 = vpop.f32.mrb[113].mxu1  ;;  %3908 = vmatpush1.bf16.msra.mxu1 %v3722_v9  ;;  %v4890_v9 = vld [vmem:[%s5590_s2 + $0xc0] sm:$0xff]  }
 0x5ae   : > { %v3487_v16 = vpop.f32.mrb[117].mxu0  ;;  %3797 = vmatpush1.bf16.msra.mxu0 %v3724_v8  ;;  %v3592_v3 = vpop.f32.mrb[114].mxu1  ;;  %v3667_v19 = vmax.f32 %v3485_v14, 0.0  ;;  %v3662_v29 = vmax.f32 %v3590_v1, 0.0 }
 0x5af   : > { %v3489_v20 = vpop.f32.mrb[118].mxu0  ;;  %v3665_v26 = vmax.f32 %v3592_v3, 0.0  ;;  %v3594_v27 = vpop.f32.mrb[115].mxu1  ;;  %v3668_v28 = vmax.f32 %v3487_v16, 0.0 }
 0x5b0   : > { %v3671_v21 = vmax.f32 %v3489_v20, 0.0  ;;  %v3491_v25 = vpop.f32.mrb[119].mxu0  ;;  %v3666_v17 = vmax.f32 %v3594_v27, 0.0  ;;  %v4894_v27 = vld [vmem:[%s5590_s2 + $0xe0] sm:$0xff]  }
 0x5b1   : > { %v3672_v24 = vmax.f32 %v3491_v25, 0.0  ;;  %v3726_v31 = vpack.c.bf16 %v3665_v26, %v3661_v18  ;;  %v4892_v25 = vld [vmem:[%s5590_s2 + $0xd0] sm:$0xff]   ;;  %v4893_v26 = vld [vmem:[%s5590_s2 + $0xd8] sm:$0xff]  }
 0x5b2   : > { %v3728_v30 = vpack.c.bf16 %v3671_v21, %v3667_v19  ;;  %v3727_v33 = vpack.c.bf16 %v3666_v17, %v3662_v29  ;;  %v4891_v21 = vld [vmem:[%s5590_s2 + $0xc8] sm:$0xff]   ;;  %v4897_v29 = vld [vmem:[%s5590_s2 + $0xf8] sm:$0xff]  }
 0x5b3   : > { %v3729_v32 = vpack.c.bf16 %v3672_v24, %v3668_v28  ;;  %v4895_v28 = vld [vmem:[%s5590_s2 + $0xe8] sm:$0xff]   ;;  %v4896_v24 = vld [vmem:[%s5590_s2 + $0xf0] sm:$0xff]  }
 0x5b4   : > { %v3598_v35 = vpop.f32.mrb[116].mxu1  ;;  %3909 = vmatprep.subr.bf16.mxu1 %v3727_v33 }
 0x5b5   : > { %v3495_v34 = vpop.f32.mrb[120].mxu0  ;;  %3798 = vmatprep.subr.bf16.mxu0 %v3729_v32  ;;  %v3669_v63 = vmax.f32 %v3598_v35, 0.0  ;;  %v3600_v37 = vpop.f32.mrb[117].mxu1  ;;  %3910 = vmatpush1.bf16.msra.mxu1 %v3726_v31 }
 0x5b6   : > { %v3497_v36 = vpop.f32.mrb[121].mxu0  ;;  %3799 = vmatpush1.bf16.msra.mxu0 %v3728_v30  ;;  %v3602_v39 = vpop.f32.mrb[118].mxu1  ;;  %v3675_v40 = vmax.f32 %v3495_v34, 0.0  ;;  %v3670_v46 = vmax.f32 %v3600_v37, 0.0 }
 0x5b7   : > { %v3499_v38 = vpop.f32.mrb[122].mxu0  ;;  %v3673_v42 = vmax.f32 %v3602_v39, 0.0  ;;  %v3604_v43 = vpop.f32.mrb[119].mxu1  ;;  %v3676_v44 = vmax.f32 %v3497_v36, 0.0 }
 0x5b8   : > { %v3679_v41 = vmax.f32 %v3499_v38, 0.0  ;;  %v3501_v2 = vpop.f32.mrb[123].mxu0  ;;  %v3674_v5 = vmax.f32 %v3604_v43, 0.0 }
 0x5b9   : > { %v3680_v45 = vmax.f32 %v3501_v2, 0.0  ;;  %v3730_v48 = vpack.c.bf16 %v3673_v42, %v3669_v63 }
 0x5ba   : > { %v3732_v47 = vpack.c.bf16 %v3679_v41, %v3675_v40  ;;  %v3731_v23 = vpack.c.bf16 %v3674_v5, %v3670_v46 }
 0x5bb   : > { %v3733_v49 = vpack.c.bf16 %v3680_v45, %v3676_v44 }
 0x5bc   : > { %v3608_v51 = vpop.f32.mrb[120].mxu1  ;;  %3911 = vmatprep.subr.bf16.mxu1 %v3731_v23 }
 0x5bd   : > { %v3505_v50 = vpop.f32.mrb[124].mxu0  ;;  %3800 = vmatprep.subr.bf16.mxu0 %v3733_v49  ;;  %v3677_v53 = vmax.f32 %v3608_v51, 0.0  ;;  %v3610_v54 = vpop.f32.mrb[121].mxu1  ;;  %3912 = vmatpush1.bf16.msra.mxu1 %v3730_v48 }
 0x5be   : > { %v3507_v52 = vpop.f32.mrb[125].mxu0  ;;  %3801 = vmatpush1.bf16.msra.mxu0 %v3732_v47  ;;  %v3612_v56 = vpop.f32.mrb[122].mxu1  ;;  %v3683_v57 = vmax.f32 %v3505_v50, 0.0  ;;  %v3678_v6 = vmax.f32 %v3610_v54, 0.0 }
 0x5bf   : > { %v3509_v55 = vpop.f32.mrb[126].mxu0  ;;  %v3681_v22 = vmax.f32 %v3612_v56, 0.0  ;;  %v3614_v61 = vpop.f32.mrb[123].mxu1  ;;  %v3684_v62 = vmax.f32 %v3507_v52, 0.0 }
 0x5c0   : > { %v3687_v58 = vmax.f32 %v3509_v55, 0.0  ;;  %v3511_v59 = vpop.f32.mrb[127].mxu0  ;;  %v3682_v7 = vmax.f32 %v3614_v61, 0.0 }
 0x5c1   : > { %v3688_v4 = vmax.f32 %v3511_v59, 0.0  ;;  %v3734_v11 = vpack.c.bf16 %v3681_v22, %v3677_v53 }
 0x5c2   : > { %v3736_v10 = vpack.c.bf16 %v3687_v58, %v3683_v57  ;;  %v3735_v8 = vpack.c.bf16 %v3682_v7, %v3678_v6 }
 0x5c3   : > { %v3737_v12 = vpack.c.bf16 %v3688_v4, %v3684_v62 }
 0x5c4   : > { %v3618_v60 = vpop.f32.mrb[124].mxu1  ;;  %3913 = vmatprep.subr.bf16.mxu1 %v3735_v8 }
 0x5c5   : > { %3802 = vmatprep.subr.bf16.mxu0 %v3737_v12  ;;  %v3685_v13 = vmax.f32 %v3618_v60, 0.0  ;;  %v3620_v14 = vpop.f32.mrb[125].mxu1  ;;  %3914 = vmatpush1.bf16.msra.mxu1 %v3734_v11 }
 0x5c6   : > { %3803 = vmatpush1.bf16.msra.mxu0 %v3736_v10  ;;  %v3622_v15 = vpop.f32.mrb[126].mxu1  ;;  %v3686_v1 = vmax.f32 %v3620_v14, 0.0 }
 0x5c7   : > { %v3689_v16 = vmax.f32 %v3622_v15, 0.0  ;;  %v3624_v18 = vpop.f32.mrb[127].mxu1 }
 0x5c8   : > { %v3690_v20 = vmax.f32 %v3624_v18, 0.0 }
 0x5c9   : > { %3821 = vmatmul.mubr.bf16.vlgmr.msra.gmra.mrb[128].mxu0 %v4890_v9  ;;  %v3738_v3 = vpack.c.bf16 %v3689_v16, %v3685_v13 }
 0x5ca   : > { %3830 = vmatprep.mubr.bf16.mxu0 %v4914_v0  ;;  %v3739_v19 = vpack.c.bf16 %v3690_v20, %v3686_v1 }
 0x5cc   : > { %3915 = vmatprep.subr.bf16.mxu1 %v3739_v19 }
 0x5cd   : > { %3916 = vmatpush1.bf16.msra.mxu1 %v3738_v3 }
 0x5d0   : > { %3934 = vmatmul.mubr.bf16.vlgmr.msra.gmra.mrb[128].mxu1 %v4890_v9 }
 0x5d1   : > { %3831 = vmatmul.mubr.bf16.gmra.mrb[132].mxu0 %v4891_v21  ;;  %3943 = vmatprep.mubr.bf16.mxu1 %v4914_v0 }
 0x5d2   : > { %3840 = vmatprep.mubr.bf16.mxu0 %v4914_v0 }
 0x5d8   : > { %3944 = vmatmul.mubr.bf16.gmra.mrb[132].mxu1 %v4891_v21 }
 0x5d9   : > { %3841 = vmatmul.mubr.bf16.gmra.mrb[136].mxu0 %v4892_v25  ;;  %3953 = vmatprep.mubr.bf16.mxu1 %v4914_v0 }
 0x5da   : > { %3850 = vmatprep.mubr.bf16.mxu0 %v4914_v0 }
 0x5e0   : > { %3954 = vmatmul.mubr.bf16.gmra.mrb[136].mxu1 %v4892_v25 }
 0x5e1   : > { %3851 = vmatmul.mubr.bf16.gmra.mrb[140].mxu0 %v4893_v26  ;;  %3963 = vmatprep.mubr.bf16.mxu1 %v4914_v0 }
 0x5e2   : > { %3860 = vmatprep.mubr.bf16.mxu0 %v4914_v0 }
 0x5e8   : > { %3964 = vmatmul.mubr.bf16.gmra.mrb[140].mxu1 %v4893_v26 }
 0x5e9   : > { %3861 = vmatmul.mubr.bf16.gmra.mrb[144].mxu0 %v4894_v27  ;;  %3973 = vmatprep.mubr.bf16.mxu1 %v4914_v0 }
 0x5ea   : > { %3870 = vmatprep.mubr.bf16.mxu0 %v4914_v0 }
 0x5f0   : > { %3974 = vmatmul.mubr.bf16.gmra.mrb[144].mxu1 %v4894_v27 }
 0x5f1   : > { %3871 = vmatmul.mubr.bf16.gmra.mrb[148].mxu0 %v4895_v28  ;;  %3983 = vmatprep.mubr.bf16.mxu1 %v4914_v0 }
 0x5f2   : > { %3880 = vmatprep.mubr.bf16.mxu0 %v4914_v0 }
 0x5f8   : > { %3984 = vmatmul.mubr.bf16.gmra.mrb[148].mxu1 %v4895_v28 }
 0x5f9   : > { %3881 = vmatmul.mubr.bf16.gmra.mrb[152].mxu0 %v4896_v24  ;;  %3993 = vmatprep.mubr.bf16.mxu1 %v4914_v0 }
 0x5fa   : > { %3890 = vmatprep.mubr.bf16.mxu0 %v4914_v0 }
 0x600   : > { %3994 = vmatmul.mubr.bf16.gmra.mrb[152].mxu1 %v4896_v24 }
 0x601   : > { %3891 = vmatmul.mubr.bf16.gmra.mrb[156].mxu0 %v4897_v29  ;;  %4003 = vmatprep.mubr.bf16.mxu1 %v4914_v0 }
 0x602   : > { %4143 = vmatprep.mubr.bf16.mxu0 %v4914_v0 }
 0x608   : > { %4004 = vmatmul.mubr.bf16.gmra.mrb[156].mxu1 %v4897_v29 }
 0x609   : > { %4184 = vmatprep.mubr.bf16.mxu1 %v4914_v0 }
 0x69c   : > { %v3822_v17 = vpop.f32.mrb[128].mxu0 }
 0x69d   : > { %v3824_v30 = vpop.f32.mrb[129].mxu0  ;;  %v4014_v32 = vmax.f32 %v3822_v17, 0.0 }
 0x69e   : > { %v3826_v31 = vpop.f32.mrb[130].mxu0  ;;  %v4015_v35 = vmax.f32 %v3824_v30, 0.0 }
 0x69f   : > { %v4018_v33 = vmax.f32 %v3826_v31, 0.0  ;;  %v3828_v34 = vpop.f32.mrb[131].mxu0 }
 0x6a0   : > { %v4019_v36 = vmax.f32 %v3828_v34, 0.0 }
 0x6a1   : > { %v4079_v63 = vpack.c.bf16 %v4018_v33, %v4014_v32 }
 0x6a2   : > { %v4080_v37 = vpack.c.bf16 %v4019_v36, %v4015_v35 }
 0x6a3   : > { %v3935_v39 = vpop.f32.mrb[128].mxu1 }
 0x6a4   : > { %v3832_v38 = vpop.f32.mrb[132].mxu0  ;;  %4111 = vmatprep.subr.bf16.mxu0 %v4080_v37  ;;  %v4016_v41 = vmax.f32 %v3935_v39, 0.0  ;;  %v3937_v2 = vpop.f32.mrb[129].mxu1 }
 0x6a5   : > { %v3834_v40 = vpop.f32.mrb[133].mxu0  ;;  %4112 = vmatpush1.bf16.msra.mxu0 %v4079_v63  ;;  %v3939_v43 = vpop.f32.mrb[130].mxu1  ;;  %v4022_v0 = vmax.f32 %v3832_v38, 0.0  ;;  %v4017_v49 = vmax.f32 %v3937_v2, 0.0 }
 0x6a6   : > { %v3836_v42 = vpop.f32.mrb[134].mxu0  ;;  %v4020_v46 = vmax.f32 %v3939_v43, 0.0  ;;  %v3941_v5 = vpop.f32.mrb[131].mxu1  ;;  %v4023_v47 = vmax.f32 %v3834_v40, 0.0 }
 0x6a7   : > { %v4026_v44 = vmax.f32 %v3836_v42, 0.0  ;;  %v3838_v45 = vpop.f32.mrb[135].mxu0  ;;  %v4021_v23 = vmax.f32 %v3941_v5, 0.0 }
 0x6a8   : > { %v4027_v48 = vmax.f32 %v3838_v45, 0.0  ;;  %v4081_v51 = vpack.c.bf16 %v4020_v46, %v4016_v41 }
 0x6a9   : > { %v4083_v50 = vpack.c.bf16 %v4026_v44, %v4022_v0  ;;  %v4082_v53 = vpack.c.bf16 %v4021_v23, %v4017_v49 }
 0x6aa   : > { %v4084_v52 = vpack.c.bf16 %v4027_v48, %v4023_v47 }
 0x6ab   : > { %v3945_v55 = vpop.f32.mrb[132].mxu1  ;;  %4152 = vmatprep.subr.bf16.mxu1 %v4082_v53 }
 0x6ac   : > { %v3842_v54 = vpop.f32.mrb[136].mxu0  ;;  %4113 = vmatprep.subr.bf16.mxu0 %v4084_v52  ;;  %v4024_v57 = vmax.f32 %v3945_v55, 0.0  ;;  %v3947_v58 = vpop.f32.mrb[133].mxu1  ;;  %4153 = vmatpush1.bf16.msra.mxu1 %v4081_v51 }
 0x6ad   : > { %v3844_v56 = vpop.f32.mrb[137].mxu0  ;;  %4114 = vmatpush1.bf16.msra.mxu0 %v4083_v50  ;;  %v3949_v22 = vpop.f32.mrb[134].mxu1  ;;  %v4030_v61 = vmax.f32 %v3842_v54, 0.0  ;;  %v4025_v12 = vmax.f32 %v3947_v58, 0.0 }
 0x6ae   : > { %v3846_v59 = vpop.f32.mrb[138].mxu0  ;;  %v4028_v6 = vmax.f32 %v3949_v22, 0.0  ;;  %v3951_v7 = vpop.f32.mrb[135].mxu1  ;;  %v4031_v10 = vmax.f32 %v3844_v56, 0.0 }
 0x6af   : > { %v4034_v62 = vmax.f32 %v3846_v59, 0.0  ;;  %v3848_v4 = vpop.f32.mrb[139].mxu0  ;;  %v4029_v8 = vmax.f32 %v3951_v7, 0.0 }
 0x6b0   : > { %v4035_v11 = vmax.f32 %v3848_v4, 0.0  ;;  %v4085_v60 = vpack.c.bf16 %v4028_v6, %v4024_v57 }
 0x6b1   : > { %v4087_v9 = vpack.c.bf16 %v4034_v62, %v4030_v61  ;;  %v4086_v14 = vpack.c.bf16 %v4029_v8, %v4025_v12 }
 0x6b2   : > { %v4088_v13 = vpack.c.bf16 %v4035_v11, %v4031_v10 }
 0x6b3   : > { %v3955_v16 = vpop.f32.mrb[136].mxu1  ;;  %4154 = vmatprep.subr.bf16.mxu1 %v4086_v14 }
 0x6b4   : > { %v3852_v15 = vpop.f32.mrb[140].mxu0  ;;  %4115 = vmatprep.subr.bf16.mxu0 %v4088_v13  ;;  %v4032_v1 = vmax.f32 %v3955_v16, 0.0  ;;  %v3957_v20 = vpop.f32.mrb[137].mxu1  ;;  %4155 = vmatpush1.bf16.msra.mxu1 %v4085_v60 }
 0x6b5   : > { %v3854_v18 = vpop.f32.mrb[141].mxu0  ;;  %4116 = vmatpush1.bf16.msra.mxu0 %v4087_v9  ;;  %v3959_v19 = vpop.f32.mrb[138].mxu1  ;;  %v4038_v21 = vmax.f32 %v3852_v15, 0.0  ;;  %v4033_v17 = vmax.f32 %v3957_v20, 0.0 }
 0x6b6   : > { %v3856_v3 = vpop.f32.mrb[142].mxu0  ;;  %v4036_v27 = vmax.f32 %v3959_v19, 0.0  ;;  %v3961_v28 = vpop.f32.mrb[139].mxu1  ;;  %v4039_v24 = vmax.f32 %v3854_v18, 0.0 }
 0x6b7   : > { %v4042_v25 = vmax.f32 %v3856_v3, 0.0  ;;  %v3858_v26 = vpop.f32.mrb[143].mxu0  ;;  %v4037_v30 = vmax.f32 %v3961_v28, 0.0 }
 0x6b8   : > { %v4043_v29 = vmax.f32 %v3858_v26, 0.0  ;;  %v4089_v32 = vpack.c.bf16 %v4036_v27, %v4032_v1 }
 0x6b9   : > { %v4091_v31 = vpack.c.bf16 %v4042_v25, %v4038_v21  ;;  %v4090_v34 = vpack.c.bf16 %v4037_v30, %v4033_v17 }
 0x6ba   : > { %v4092_v33 = vpack.c.bf16 %v4043_v29, %v4039_v24 }
 0x6bb   : > { %v3965_v36 = vpop.f32.mrb[140].mxu1  ;;  %4156 = vmatprep.subr.bf16.mxu1 %v4090_v34 }
 0x6bc   : > { %v3862_v35 = vpop.f32.mrb[144].mxu0  ;;  %4117 = vmatprep.subr.bf16.mxu0 %v4092_v33  ;;  %v4040_v37 = vmax.f32 %v3965_v36, 0.0  ;;  %v3967_v38 = vpop.f32.mrb[141].mxu1  ;;  %4157 = vmatpush1.bf16.msra.mxu1 %v4089_v32 }
 0x6bd   : > { %v3864_v63 = vpop.f32.mrb[145].mxu0  ;;  %4118 = vmatpush1.bf16.msra.mxu0 %v4091_v31  ;;  %v3969_v40 = vpop.f32.mrb[142].mxu1  ;;  %v4046_v41 = vmax.f32 %v3862_v35, 0.0  ;;  %v4041_v46 = vmax.f32 %v3967_v38, 0.0 }
 0x6be   : > { %v3866_v39 = vpop.f32.mrb[146].mxu0  ;;  %v4044_v43 = vmax.f32 %v3969_v40, 0.0  ;;  %v3971_v0 = vpop.f32.mrb[143].mxu1  ;;  %v4047_v44 = vmax.f32 %v3864_v63, 0.0 }
 0x6bf   : > { %v4050_v2 = vmax.f32 %v3866_v39, 0.0  ;;  %v3868_v42 = vpop.f32.mrb[147].mxu0  ;;  %v4045_v5 = vmax.f32 %v3971_v0, 0.0 }
 0x6c0   : > { %v4051_v45 = vmax.f32 %v3868_v42, 0.0  ;;  %v4093_v48 = vpack.c.bf16 %v4044_v43, %v4040_v37 }
 0x6c1   : > { %v4095_v47 = vpack.c.bf16 %v4050_v2, %v4046_v41  ;;  %v4094_v23 = vpack.c.bf16 %v4045_v5, %v4041_v46 }
 0x6c2   : > { %v4096_v49 = vpack.c.bf16 %v4051_v45, %v4047_v44 }
 0x6c3   : > { %v3975_v51 = vpop.f32.mrb[144].mxu1  ;;  %4158 = vmatprep.subr.bf16.mxu1 %v4094_v23 }
 0x6c4   : > { %v3872_v50 = vpop.f32.mrb[148].mxu0  ;;  %4119 = vmatprep.subr.bf16.mxu0 %v4096_v49  ;;  %v4048_v53 = vmax.f32 %v3975_v51, 0.0  ;;  %v3977_v54 = vpop.f32.mrb[145].mxu1  ;;  %4159 = vmatpush1.bf16.msra.mxu1 %v4093_v48  ;;  %v4078_v48 = vld [vmem:[%s5591_s3] sm:$0xf] }
 0x6c5   : > { %v3874_v52 = vpop.f32.mrb[149].mxu0  ;;  %4120 = vmatpush1.bf16.msra.mxu0 %v4095_v47  ;;  %v3979_v56 = vpop.f32.mrb[146].mxu1  ;;  %v4054_v57 = vmax.f32 %v3872_v50, 0.0  ;;  %v4049_v6 = vmax.f32 %v3977_v54, 0.0 }
 0x6c6   : > { %v3876_v55 = vpop.f32.mrb[150].mxu0  ;;  %v4052_v22 = vmax.f32 %v3979_v56, 0.0  ;;  %v3981_v61 = vpop.f32.mrb[147].mxu1  ;;  %v4055_v62 = vmax.f32 %v3874_v52, 0.0 }
 0x6c7   : > { %v4058_v58 = vmax.f32 %v3876_v55, 0.0  ;;  %v3878_v59 = vpop.f32.mrb[151].mxu0  ;;  %v4053_v7 = vmax.f32 %v3981_v61, 0.0 }
 0x6c8   : > { %v4059_v4 = vmax.f32 %v3878_v59, 0.0  ;;  %v4097_v11 = vpack.c.bf16 %v4052_v22, %v4048_v53 }
 0x6c9   : > { %v4099_v10 = vpack.c.bf16 %v4058_v58, %v4054_v57  ;;  %v4098_v8 = vpack.c.bf16 %v4053_v7, %v4049_v6 }
 0x6ca   : > { %v4100_v12 = vpack.c.bf16 %v4059_v4, %v4055_v62 }
 0x6cb   : > { %v3985_v60 = vpop.f32.mrb[148].mxu1  ;;  %4160 = vmatprep.subr.bf16.mxu1 %v4098_v8 }
 0x6cc   : > { %v3882_v9 = vpop.f32.mrb[152].mxu0  ;;  %4121 = vmatprep.subr.bf16.mxu0 %v4100_v12  ;;  %v4056_v14 = vmax.f32 %v3985_v60, 0.0  ;;  %v3987_v15 = vpop.f32.mrb[149].mxu1  ;;  %4161 = vmatpush1.bf16.msra.mxu1 %v4097_v11 }
 0x6cd   : > { %v3884_v13 = vpop.f32.mrb[153].mxu0  ;;  %4122 = vmatpush1.bf16.msra.mxu0 %v4099_v10  ;;  %v3989_v18 = vpop.f32.mrb[150].mxu1  ;;  %v4062_v1 = vmax.f32 %v3882_v9, 0.0  ;;  %v4057_v27 = vmax.f32 %v3987_v15, 0.0 }
 0x6ce   : > { %v3886_v16 = vpop.f32.mrb[154].mxu0  ;;  %v4060_v19 = vmax.f32 %v3989_v18, 0.0  ;;  %v3991_v21 = vpop.f32.mrb[151].mxu1  ;;  %v4063_v25 = vmax.f32 %v3884_v13, 0.0 }
 0x6cf   : > { %v4066_v20 = vmax.f32 %v3886_v16, 0.0  ;;  %v3888_v3 = vpop.f32.mrb[155].mxu0  ;;  %v4061_v28 = vmax.f32 %v3991_v21, 0.0 }
 0x6d0   : > { %v4067_v26 = vmax.f32 %v3888_v3, 0.0  ;;  %v4101_v29 = vpack.c.bf16 %v4060_v19, %v4056_v14 }
 0x6d1   : > { %v4103_v24 = vpack.c.bf16 %v4066_v20, %v4062_v1  ;;  %v4102_v30 = vpack.c.bf16 %v4061_v28, %v4057_v27 }
 0x6d2   : > { %v4104_v17 = vpack.c.bf16 %v4067_v26, %v4063_v25 }
 0x6d3   : > { %v3995_v32 = vpop.f32.mrb[152].mxu1  ;;  %4162 = vmatprep.subr.bf16.mxu1 %v4102_v30 }
 0x6d4   : > { %v3892_v31 = vpop.f32.mrb[156].mxu0  ;;  %4123 = vmatprep.subr.bf16.mxu0 %v4104_v17  ;;  %v4064_v34 = vmax.f32 %v3995_v32, 0.0  ;;  %v3997_v35 = vpop.f32.mrb[153].mxu1  ;;  %4163 = vmatpush1.bf16.msra.mxu1 %v4101_v29 }
 0x6d5   : > { %v3894_v33 = vpop.f32.mrb[157].mxu0  ;;  %4124 = vmatpush1.bf16.msra.mxu0 %v4103_v24  ;;  %v3999_v63 = vpop.f32.mrb[154].mxu1  ;;  %v4070_v37 = vmax.f32 %v3892_v31, 0.0  ;;  %v4065_v43 = vmax.f32 %v3997_v35, 0.0 }
 0x6d6   : > { %v3896_v36 = vpop.f32.mrb[158].mxu0  ;;  %v4068_v40 = vmax.f32 %v3999_v63, 0.0  ;;  %v4001_v41 = vpop.f32.mrb[155].mxu1  ;;  %v4071_v2 = vmax.f32 %v3894_v33, 0.0 }
 0x6d7   : > { %v4074_v38 = vmax.f32 %v3896_v36, 0.0  ;;  %v3898_v39 = vpop.f32.mrb[159].mxu0  ;;  %v4069_v0 = vmax.f32 %v4001_v41, 0.0 }
 0x6d8   : > { %v4075_v42 = vmax.f32 %v3898_v39, 0.0  ;;  %v4105_v45 = vpack.c.bf16 %v4068_v40, %v4064_v34 }
 0x6d9   : > { %v4107_v44 = vpack.c.bf16 %v4074_v38, %v4070_v37  ;;  %v4106_v5 = vpack.c.bf16 %v4069_v0, %v4065_v43 }
 0x6da   : > { %v4108_v46 = vpack.c.bf16 %v4075_v42, %v4071_v2 }
 0x6db   : > { %v4005_v47 = vpop.f32.mrb[156].mxu1  ;;  %4164 = vmatprep.subr.bf16.mxu1 %v4106_v5 }
 0x6dc   : > { %4125 = vmatprep.subr.bf16.mxu0 %v4108_v46  ;;  %v4072_v49 = vmax.f32 %v4005_v47, 0.0  ;;  %v4007_v23 = vpop.f32.mrb[157].mxu1  ;;  %4165 = vmatpush1.bf16.msra.mxu1 %v4105_v45 }
 0x6dd   : > { %4126 = vmatpush1.bf16.msra.mxu0 %v4107_v44  ;;  %v4009_v50 = vpop.f32.mrb[158].mxu1  ;;  %v4073_v53 = vmax.f32 %v4007_v23, 0.0 }
 0x6de   : > { %v4076_v51 = vmax.f32 %v4009_v50, 0.0  ;;  %v4011_v52 = vpop.f32.mrb[159].mxu1 }
 0x6df   : > { %v4077_v54 = vmax.f32 %v4011_v52, 0.0 }
 0x6e0   : > { %4144 = vmatmul.mubr.bf16.vlgmr.msra.gmra.mrb[160].mxu0 %v4078_v48  ;;  %v4109_v55 = vpack.c.bf16 %v4076_v51, %v4072_v49 }
 0x6e1   : > { %v4110_v56 = vpack.c.bf16 %v4077_v54, %v4073_v53 }
 0x6e3   : > { %4166 = vmatprep.subr.bf16.mxu1 %v4110_v56 }
 0x6e4   : > { %4167 = vmatpush1.bf16.msra.mxu1 %v4109_v55 }
 0x6e7   : > { %4185 = vmatmul.mubr.bf16.vlgmr.msra.gmra.mrb[160].mxu1 %v4078_v48 }
 0x7b3   : > { %v4145_v57 = vpop.f32.mrb[160].mxu0 }
 0x7b4   : > { %4193 = vst [vmem:[%s199_s27] sm:$0xff] %v4145_v57  ;;  %v4147_v58 = vpop.f32.mrb[161].mxu0 }
 0x7b5   : > { %4194 = vst [vmem:[%s199_s27 + $0x8] sm:$0xff] %v4147_v58  ;;  %v4149_v59 = vpop.f32.mrb[162].mxu0 }
 0x7b6   : > { %v4150_v22 = vpop.f32.mrb[163].mxu0 }
 0x7ba   : > { %v4186_v61 = vpop.f32.mrb[160].mxu1 }
 0x7bb   : > { %4195 = vst [vmem:[%s199_s27 + $0x10] sm:$0xff] %v4186_v61  ;;  %v4188_v62 = vpop.f32.mrb[161].mxu1 }
 0x7bc   : > { %4196 = vst [vmem:[%s199_s27 + $0x18] sm:$0xff] %v4188_v62  ;;  %v4190_v4 = vpop.f32.mrb[162].mxu1 }
 0x7bd   : > { %v4191_v6 = vpop.f32.mrb[163].mxu1 }
 0x7be PF: > { %s14_s15 = sadd.s32 1, %s4912_s15  }
 0x7bf   : > { %p11_p4 = scmp.ge.s32.totalorder %s14_s15, 4  }
 0x7c1   :  { %13 = sbr.rel (!%p11_p4) target bundleno = 1 (0x1), region = 73 }

</bundles_post_ra>
